<compile_context>
chip_gen: v5e
topology: v5e:2x2
jax: 0.10.0
libtpu: 0.0.40
codegen_flags: <defaults>
</compile_context>

<pallas_src>
import math
import functools

import jax
import jax.numpy as jnp
from jax import lax
from jax.experimental import pallas as pl
from jax.experimental.pallas import tpu as pltpu


def mha_flash_kernel(num_heads, head_dim,
                     q_ref, k_ref, v_ref,
                     wq_ref, wk_ref, wv_ref, wo_ref,
                     bq_ref, bk_ref, bv_ref, bo_ref,
                     o_ref,
                     q_sc, m_sc, l_sc, acc_sc):
    """One (batch, q-tile) of attention, iterated over KV tiles (grid axis 2).

    q_ref: (1, tq, H) bf16   k_ref/v_ref: (1, tk, H) bf16
    w*_ref: (H, H) bf16      b*_ref: (1, H) f32       o_ref: (1, tq, H)
    q_sc: (tq, H) bf16 scratch — projected (pre-scaled) query tile
    m_sc / l_sc: (tq, num_heads) f32 — online-softmax running max / denominator
    acc_sc: (num_heads, tq, head_dim) f32 — running context accumulator
    """
    ki = pl.program_id(2)
    nk = pl.num_programs(2)
    H = num_heads * head_dim
    hd = head_dim

    @pl.when(ki == 0)
    def _init():
        # Project this query tile once; 1/sqrt(hd) already folded into wq/bq.
        q_proj = jnp.dot(q_ref[0], wq_ref[...],
                         preferred_element_type=jnp.float32) + bq_ref[...]
        q_sc[...] = q_proj.astype(q_sc.dtype)
        m_sc[...] = jnp.full(m_sc.shape, -jnp.inf, dtype=m_sc.dtype)
        l_sc[...] = jnp.zeros(l_sc.shape, dtype=l_sc.dtype)
        acc_sc[...] = jnp.zeros(acc_sc.shape, dtype=acc_sc.dtype)

    # Project this KV tile (bf16 MXU operands, f32 accumulation); cast right away
    # so no f32 (tk, H) intermediate stays live across the head loop.
    k_proj = (jnp.dot(k_ref[0], wk_ref[...], preferred_element_type=jnp.float32)
              + bk_ref[...]).astype(jnp.bfloat16)
    v_proj = (jnp.dot(v_ref[0], wv_ref[...], preferred_element_type=jnp.float32)
              + bv_ref[...]).astype(jnp.bfloat16)

    # TODO(synk): for large num_heads, switch to lax.fori_loop + pl.ds head slicing
    #             (with 128/head_dim head grouping) to bound unrolled code size.
    for h in range(num_heads):
        sl = slice(h * hd, (h + 1) * hd)
        qh = q_sc[:, sl]            # (tq, hd) bf16
        kh = k_proj[:, sl]          # (tk, hd) bf16
        vh = v_proj[:, sl]          # (tk, hd) bf16

        # scores = qh @ kh^T without materializing a transpose: contract last dims.
        s = lax.dot_general(qh, kh, (((1,), (1,)), ((), ())),
                            preferred_element_type=jnp.float32)   # (tq, tk) f32

        m_prev = m_sc[:, h:h + 1]                                 # (tq, 1)
        m_new = jnp.maximum(m_prev, jnp.max(s, axis=-1, keepdims=True))
        alpha = jnp.exp(m_prev - m_new)
        p = jnp.exp(s - m_new)
        l_sc[:, h:h + 1] = alpha * l_sc[:, h:h + 1] + jnp.sum(p, axis=-1, keepdims=True)
        acc_sc[h] = alpha * acc_sc[h] + jnp.dot(p.astype(jnp.bfloat16), vh,
                                                preferred_element_type=jnp.float32)
        m_sc[:, h:h + 1] = m_new

    @pl.when(ki == nk - 1)
    def _finalize():
        tq = q_sc.shape[0]
        out = jnp.zeros((tq, H), jnp.float32)
        for h in range(num_heads):
            sl = slice(h * hd, (h + 1) * hd)
            inv_l = pl.reciprocal(l_sc[:, h:h + 1], approx=True)   # EUP slot
            ctx_h = (acc_sc[h] * inv_l).astype(jnp.bfloat16)        # (tq, hd)
            # Output projection folded into the head loop: lane-dense (tq, H)
            # f32 accumulation instead of assembling ctx with sub-lane stores.
            out = out + jnp.dot(ctx_h, wo_ref[sl, :],
                                preferred_element_type=jnp.float32)
        o_ref[0] = (out + bo_ref[...]).astype(o_ref.dtype)


def _pick_tile(seq_len, target):
    """Largest multiple-of-8 divisor of seq_len that is <= target (else full seq)."""
    if seq_len <= target:
        return seq_len
    best = None
    t = 8
    while t <= target:
        if seq_len % t == 0:
            best = t
        t += 8
    return best if best is not None else seq_len


def _vmem_limit_bytes():
    """Generation-aware scoped-VMEM limit: ~3/4 of physical VMEM (≈48 MiB on v7x,
    ≈96 MiB on v5e/v6e). Falls back to the compiler default if the query fails."""
    try:
        cap = int(pltpu.get_tpu_info().vmem_capacity_bytes)
        return (cap * 3) // 4
    except Exception:
        return None


def multi_head_attention(query, key, value, params, num_heads,
                         *, tq_target=256, tk_target=256):
    """query: (B, Sq, H), key/value: (B, Skv, H), float32. mask not supported."""
    B, Sq, H = query.shape
    Bk, Skv, Hk = key.shape
    assert key.shape == value.shape, "key and value must have the same shape"
    assert Bk == B and Hk == H, "key/value batch & hidden must match query"
    head_dim = H // num_heads
    assert head_dim * num_heads == H, "hidden_size must be divisible by num_heads"
    # NOTE: for real workloads H (and ideally head_dim) should be multiples of 128
    # for lane-dense loads/stores; the tiny test shape (H=32) is below vreg width.

    wq, bq, wk, bk, wv, bv, wo, bo = params
    scale = 1.0 / math.sqrt(head_dim)

    # Host-side prep: bf16 activations (halve DMA), fold score scale into Q
    # projection, bf16 MXU weight operands, f32 biases broadcastable as (1, H).
    q_in = query.astype(jnp.bfloat16)
    k_in = key.astype(jnp.bfloat16)
    v_in = value.astype(jnp.bfloat16)
    wq_s = (wq * scale).astype(jnp.bfloat16)
    wk_b = wk.astype(jnp.bfloat16)
    wv_b = wv.astype(jnp.bfloat16)
    wo_b = wo.astype(jnp.bfloat16)
    bq_s = (bq * scale).reshape(1, H).astype(jnp.float32)
    bk_r = bk.reshape(1, H).astype(jnp.float32)
    bv_r = bv.reshape(1, H).astype(jnp.float32)
    bo_r = bo.reshape(1, H).astype(jnp.float32)

    tq = _pick_tile(Sq, tq_target)
    tk = _pick_tile(Skv, tk_target)
    grid = (B, Sq // tq, Skv // tk)

    kernel = functools.partial(mha_flash_kernel, num_heads, head_dim)

    # Advisory cost estimate so XLA schedules neighbors around the custom call.
    proj_flops = 2 * B * H * H * (2 * Sq + 2 * Skv)          # q + out + k + v projections
    attn_flops = 4 * B * Sq * Skv * H                        # scores + p@v
    weight_bytes = 2 * (wq_s.size + wk_b.size + wv_b.size + wo_b.size)
    act_bytes = 2 * (q_in.size + (Sq // tq) * (k_in.size + v_in.size)) + 4 * query.size
    cost = pl.CostEstimate(flops=int(proj_flops + attn_flops),
                           transcendentals=int(B * num_heads * Sq * Skv),
                           bytes_accessed=int(weight_bytes + act_bytes))

    compiler_params = pltpu.CompilerParams(
        dimension_semantics=("parallel", "parallel", "arbitrary"),
        vmem_limit_bytes=_vmem_limit_bytes())

    def build(single_buffer_weights):
        def const_spec(shape):
            idx = lambda b, qi, ki: (0,) * len(shape)
            if single_buffer_weights:
                # Grid-invariant operands: no need for a second pipeline buffer.
                return pl.BlockSpec(shape, idx, pipeline_mode=pl.Buffered(1))
            return pl.BlockSpec(shape, idx)

        in_specs = [
            pl.BlockSpec((1, tq, H), lambda b, qi, ki: (b, qi, 0)),   # query
            pl.BlockSpec((1, tk, H), lambda b, qi, ki: (b, ki, 0)),   # key
            pl.BlockSpec((1, tk, H), lambda b, qi, ki: (b, ki, 0)),   # value
            const_spec((H, H)), const_spec((H, H)),                   # wq, wk
            const_spec((H, H)), const_spec((H, H)),                   # wv, wo
            const_spec((1, H)), const_spec((1, H)),                   # bq, bk
            const_spec((1, H)), const_spec((1, H)),                   # bv, bo
        ]
        out_spec = pl.BlockSpec((1, tq, H), lambda b, qi, ki: (b, qi, 0))
        scratch_shapes = [
            pltpu.VMEM((tq, H), jnp.bfloat16),                        # projected q tile
            pltpu.VMEM((tq, num_heads), jnp.float32),                 # running max
            pltpu.VMEM((tq, num_heads), jnp.float32),                 # running denom
            pltpu.VMEM((num_heads, tq, head_dim), jnp.float32),       # running context
        ]
        return pl.pallas_call(
            kernel,
            out_shape=jax.ShapeDtypeStruct((B, Sq, H), query.dtype),
            grid_spec=pltpu.PrefetchScalarGridSpec(
                num_scalar_prefetch=0, grid=grid,
                in_specs=in_specs, out_specs=out_spec,
                scratch_shapes=scratch_shapes),
            compiler_params=compiler_params,
            cost_estimate=cost,
        )

    args = (q_in, k_in, v_in, wq_s, wk_b, wv_b, wo_b, bq_s, bk_r, bv_r, bo_r)
    try:
        return build(True)(*args)
    except Exception:
        # Fallback: default (double-buffered) weight specs if pl.Buffered(1) is
        # unsupported by the installed Pallas — running cleanly beats the VMEM win.
        return build(False)(*args)


def reference_mha(query, key, value, params, num_heads):
    """Pure-JAX f32 reference matching the PyTorch module's forward (mask=None)."""
    B, Sq, H = query.shape
    Skv = key.shape[1]
    hd = H // num_heads
    wq, bq, wk, bk, wv, bv, wo, bo = params
    q = (query @ wq + bq).reshape(B, Sq, num_heads, hd).transpose(0, 2, 1, 3)
    k = (key @ wk + bk).reshape(B, Skv, num_heads, hd).transpose(0, 2, 1, 3)
    v = (value @ wv + bv).reshape(B, Skv, num_heads, hd).transpose(0, 2, 1, 3)
    scores = jnp.einsum("bhqd,bhkd->bhqk", q, k) / math.sqrt(hd)
    attn = jax.nn.softmax(scores, axis=-1)
    ctx = jnp.einsum("bhqk,bhkd->bhqd", attn, v)
    ctx = ctx.transpose(0, 2, 1, 3).reshape(B, Sq, H)
    return ctx @ wo + bo


if __name__ == "__main__":
    B, S, H = 2, 8, 32
    num_heads = 4

    key0 = jax.random.PRNGKey(0)
    keys = jax.random.split(key0, 16)
    bound = 1.0 / math.sqrt(H)

    def init_w(k):
        return jax.random.uniform(k, (H, H), jnp.float32, -bound, bound)

    def init_b(k):
        return jax.random.uniform(k, (H,), jnp.float32, -bound, bound)

    params = (
        init_w(keys[0]), init_b(keys[1]),   # query
        init_w(keys[2]), init_b(keys[3]),   # key
        init_w(keys[4]), init_b(keys[5]),   # value
        init_w(keys[6]), init_b(keys[7]),   # out
    )

    # bf16 MXU operands + online softmax -> compare vs f32 reference, loose tol.
    TOL = 5e-2

    # 1) Cross-attention (distinct query/key/value).
    query = jax.random.normal(keys[8], (B, S, H), jnp.float32)
    key_in = jax.random.normal(keys[9], (B, S, H), jnp.float32)
    value = jax.random.normal(keys[10], (B, S, H), jnp.float32)
    out_cross = jax.block_until_ready(
        multi_head_attention(query, key_in, value, params, num_heads))
    ref_cross = reference_mha(query, key_in, value, params, num_heads)
    assert out_cross.shape == (B, S, H)
    assert jnp.allclose(out_cross, ref_cross, atol=TOL, rtol=TOL), "cross-attention mismatch"

    # 2) Self-attention (same tensor for query/key/value).
    x = jax.random.normal(keys[11], (B, S, H), jnp.float32)
    out_self = jax.block_until_ready(
        multi_head_attention(x, x, x, params, num_heads))
    ref_self = reference_mha(x, x, x, params, num_heads)
    assert out_self.shape == (B, S, H)
    assert jnp.allclose(out_self, ref_self, atol=TOL, rtol=TOL), "self-attention mismatch"

    # 3) Tiled path: longer sequence with small tile targets -> grid (B, 2, 2),
    #    exercising the online softmax across multiple KV tiles and q tiling.
    S2 = 16
    q2 = jax.random.normal(keys[12], (B, S2, H), jnp.float32)
    k2 = jax.random.normal(keys[13], (B, S2, H), jnp.float32)
    v2 = jax.random.normal(keys[14], (B, S2, H), jnp.float32)
    out_tiled = jax.block_until_ready(
        multi_head_attention(q2, k2, v2, params, num_heads,
                             tq_target=8, tk_target=8))
    ref_tiled = reference_mha(q2, k2, v2, params, num_heads)
    assert out_tiled.shape == (B, S2, H)
    assert jnp.allclose(out_tiled, ref_tiled, atol=TOL, rtol=TOL), "tiled-attention mismatch"

    print("KERNEL_OK")
</pallas_src>

<mosaic_0001>
module attributes {stable_mosaic.version = 11 : i64} {
  func.func @mha_flash_kernel(%arg0: i32, %arg1: i32, %arg2: i32, %arg3: memref<1x8x32xbf16, #tpu.memory_space<vmem>>, %arg4: memref<1x8x32xbf16, #tpu.memory_space<vmem>>, %arg5: memref<1x8x32xbf16, #tpu.memory_space<vmem>>, %arg6: memref<32x32xbf16, #tpu.memory_space<vmem>>, %arg7: memref<32x32xbf16, #tpu.memory_space<vmem>>, %arg8: memref<32x32xbf16, #tpu.memory_space<vmem>>, %arg9: memref<32x32xbf16, #tpu.memory_space<vmem>>, %arg10: memref<1x32xf32, #tpu.memory_space<vmem>>, %arg11: memref<1x32xf32, #tpu.memory_space<vmem>>, %arg12: memref<1x32xf32, #tpu.memory_space<vmem>>, %arg13: memref<1x32xf32, #tpu.memory_space<vmem>>, %arg14: memref<1x8x32xf32, #tpu.memory_space<vmem>>, %arg15: memref<8x32xbf16, #tpu.memory_space<vmem>>, %arg16: memref<8x4xf32, #tpu.memory_space<vmem>>, %arg17: memref<8x4xf32, #tpu.memory_space<vmem>>, %arg18: memref<4x8x8xf32, #tpu.memory_space<vmem>>) attributes {dimension_semantics = [#tpu.dimension_semantics<parallel>, #tpu.dimension_semantics<parallel>, #tpu.dimension_semantics<arbitrary>], iteration_bounds = array<i64: 2, 1, 1>, scalar_prefetch = 0 : i64, scratch_operands = 4 : i64, tpu.core_type = #tpu.core_type<tc>, window_params = [{transform_indices = @transform_0, window_bounds = array<i64: 1, 8, 32>}, {transform_indices = @transform_1, window_bounds = array<i64: 1, 8, 32>}, {transform_indices = @transform_2, window_bounds = array<i64: 1, 8, 32>}, {pipeline_mode = #tpu.pipeline_mode<synchronous>, transform_indices = @transform_3, window_bounds = array<i64: 32, 32>}, {pipeline_mode = #tpu.pipeline_mode<synchronous>, transform_indices = @transform_4, window_bounds = array<i64: 32, 32>}, {pipeline_mode = #tpu.pipeline_mode<synchronous>, transform_indices = @transform_5, window_bounds = array<i64: 32, 32>}, {pipeline_mode = #tpu.pipeline_mode<synchronous>, transform_indices = @transform_6, window_bounds = array<i64: 32, 32>}, {pipeline_mode = #tpu.pipeline_mode<synchronous>, transform_indices = @transform_7, window_bounds = array<i64: 1, 32>}, {pipeline_mode = #tpu.pipeline_mode<synchronous>, transform_indices = @transform_8, window_bounds = array<i64: 1, 32>}, {pipeline_mode = #tpu.pipeline_mode<synchronous>, transform_indices = @transform_9, window_bounds = array<i64: 1, 32>}, {pipeline_mode = #tpu.pipeline_mode<synchronous>, transform_indices = @transform_10, window_bounds = array<i64: 1, 32>}, {transform_indices = @transform_11, window_bounds = array<i64: 1, 8, 32>}]} {
    %c0_i32 = arith.constant 0 : i32
    %0 = arith.cmpi eq, %arg2, %c0_i32 : i32
    %1 = arith.extui %0 : i1 to i32
    %c0_i32_0 = arith.constant 0 : i32
    %2 = arith.cmpi ne, %1, %c0_i32_0 : i32
    scf.if %2 {
      %c0_91 = arith.constant 0 : index
      %c0_92 = arith.constant 0 : index
      %c0_93 = arith.constant 0 : index
      %142 = vector.load %arg3[%c0_91, %c0_92, %c0_93] : memref<1x8x32xbf16, #tpu.memory_space<vmem>>, vector<1x8x32xbf16>
      %143 = vector.shape_cast %142 : vector<1x8x32xbf16> to vector<8x32xbf16>
      %c0_94 = arith.constant 0 : index
      %c0_95 = arith.constant 0 : index
      %144 = vector.load %arg6[%c0_94, %c0_95] : memref<32x32xbf16, #tpu.memory_space<vmem>>, vector<32x32xbf16>
      %cst_96 = arith.constant dense<0.000000e+00> : vector<8x32xf32>
      %145 = tpu.matmul %143, %144, %cst_96 {dimension_numbers = #tpu.dot_dimension_numbers<[1], [0], [0], [1], [0, 0, 1, 1], [], []>} : vector<8x32xbf16>, vector<32x32xbf16>, vector<8x32xf32> -> vector<8x32xf32>
      %c0_97 = arith.constant 0 : index
      %c0_98 = arith.constant 0 : index
      %146 = vector.load %arg10[%c0_97, %c0_98] : memref<1x32xf32, #tpu.memory_space<vmem>>, vector<1x32xf32>
      %147 = vector.broadcast %146 : vector<1x32xf32> to vector<8x32xf32>
      %148 = arith.addf %145, %147 : vector<8x32xf32>
      %149 = arith.truncf %148 : vector<8x32xf32> to vector<8x32xbf16>
      %c0_99 = arith.constant 0 : index
      %c0_100 = arith.constant 0 : index
      %150 = vector.load %arg15[%c0_99, %c0_100] : memref<8x32xbf16, #tpu.memory_space<vmem>>, vector<8x32xbf16>
      tpu.vector_store %arg15[%c0_99, %c0_100], %149 {strides = array<i32>} : memref<8x32xbf16, #tpu.memory_space<vmem>>, vector<8x32xbf16>,
      %cst_101 = arith.constant 0xFF800000 : f32
      %151 = vector.broadcast %cst_101 : f32 to vector<8x4xf32>
      %c0_102 = arith.constant 0 : index
      %c0_103 = arith.constant 0 : index
      %152 = vector.load %arg16[%c0_102, %c0_103] : memref<8x4xf32, #tpu.memory_space<vmem>>, vector<8x4xf32>
      tpu.vector_store %arg16[%c0_102, %c0_103], %151 {strides = array<i32>} : memref<8x4xf32, #tpu.memory_space<vmem>>, vector<8x4xf32>,
      %cst_104 = arith.constant 0.000000e+00 : f32
      %153 = vector.broadcast %cst_104 : f32 to vector<8x4xf32>
      %c0_105 = arith.constant 0 : index
      %c0_106 = arith.constant 0 : index
      %154 = vector.load %arg17[%c0_105, %c0_106] : memref<8x4xf32, #tpu.memory_space<vmem>>, vector<8x4xf32>
      tpu.vector_store %arg17[%c0_105, %c0_106], %153 {strides = array<i32>} : memref<8x4xf32, #tpu.memory_space<vmem>>, vector<8x4xf32>,
      %cst_107 = arith.constant 0.000000e+00 : f32
      %155 = vector.broadcast %cst_107 : f32 to vector<4x8x8xf32>
      %c0_108 = arith.constant 0 : index
      %c0_109 = arith.constant 0 : index
      %c0_110 = arith.constant 0 : index
      %156 = vector.load %arg18[%c0_108, %c0_109, %c0_110] : memref<4x8x8xf32, #tpu.memory_space<vmem>>, vector<4x8x8xf32>
      tpu.vector_store %arg18[%c0_108, %c0_109, %c0_110], %155 {strides = array<i32>} : memref<4x8x8xf32, #tpu.memory_space<vmem>>, vector<4x8x8xf32>,
    } else {
    }
    %c0 = arith.constant 0 : index
    %c0_1 = arith.constant 0 : index
    %c0_2 = arith.constant 0 : index
    %3 = vector.load %arg4[%c0, %c0_1, %c0_2] : memref<1x8x32xbf16, #tpu.memory_space<vmem>>, vector<1x8x32xbf16>
    %4 = vector.shape_cast %3 : vector<1x8x32xbf16> to vector<8x32xbf16>
    %c0_3 = arith.constant 0 : index
    %c0_4 = arith.constant 0 : index
    %5 = vector.load %arg7[%c0_3, %c0_4] : memref<32x32xbf16, #tpu.memory_space<vmem>>, vector<32x32xbf16>
    %cst = arith.constant dense<0.000000e+00> : vector<8x32xf32>
    %6 = tpu.matmul %4, %5, %cst {dimension_numbers = #tpu.dot_dimension_numbers<[1], [0], [0], [1], [0, 0, 1, 1], [], []>} : vector<8x32xbf16>, vector<32x32xbf16>, vector<8x32xf32> -> vector<8x32xf32>
    %c0_5 = arith.constant 0 : index
    %c0_6 = arith.constant 0 : index
    %7 = vector.load %arg11[%c0_5, %c0_6] : memref<1x32xf32, #tpu.memory_space<vmem>>, vector<1x32xf32>
    %8 = vector.broadcast %7 : vector<1x32xf32> to vector<8x32xf32>
    %9 = arith.addf %6, %8 : vector<8x32xf32>
    %10 = arith.truncf %9 : vector<8x32xf32> to vector<8x32xbf16>
    %c0_7 = arith.constant 0 : index
    %c0_8 = arith.constant 0 : index
    %c0_9 = arith.constant 0 : index
    %11 = vector.load %arg5[%c0_7, %c0_8, %c0_9] : memref<1x8x32xbf16, #tpu.memory_space<vmem>>, vector<1x8x32xbf16>
    %12 = vector.shape_cast %11 : vector<1x8x32xbf16> to vector<8x32xbf16>
    %c0_10 = arith.constant 0 : index
    %c0_11 = arith.constant 0 : index
    %13 = vector.load %arg8[%c0_10, %c0_11] : memref<32x32xbf16, #tpu.memory_space<vmem>>, vector<32x32xbf16>
    %cst_12 = arith.constant dense<0.000000e+00> : vector<8x32xf32>
    %14 = tpu.matmul %12, %13, %cst_12 {dimension_numbers = #tpu.dot_dimension_numbers<[1], [0], [0], [1], [0, 0, 1, 1], [], []>} : vector<8x32xbf16>, vector<32x32xbf16>, vector<8x32xf32> -> vector<8x32xf32>
    %c0_13 = arith.constant 0 : index
    %c0_14 = arith.constant 0 : index
    %15 = vector.load %arg12[%c0_13, %c0_14] : memref<1x32xf32, #tpu.memory_space<vmem>>, vector<1x32xf32>
    %16 = vector.broadcast %15 : vector<1x32xf32> to vector<8x32xf32>
    %17 = arith.addf %14, %16 : vector<8x32xf32>
    %18 = arith.truncf %17 : vector<8x32xf32> to vector<8x32xbf16>
    %c0_15 = arith.constant 0 : index
    %c0_16 = arith.constant 0 : index
    %19 = vector.load %arg15[%c0_15, %c0_16] : memref<8x32xbf16, #tpu.memory_space<vmem>>, vector<8x8xbf16>
    %20 = vector.extract_strided_slice %10 {offsets = [0, 0], sizes = [8, 8], strides = [1, 1]} : vector<8x32xbf16> to vector<8x8xbf16>
    %21 = vector.extract_strided_slice %18 {offsets = [0, 0], sizes = [8, 8], strides = [1, 1]} : vector<8x32xbf16> to vector<8x8xbf16>
    %cst_17 = arith.constant dense<0.000000e+00> : vector<8x8xf32>
    %22 = tpu.matmul %19, %20, %cst_17 {dimension_numbers = #tpu.dot_dimension_numbers<[1], [1], [0], [0], [0, 0, 1, 0], [], []>} : vector<8x8xbf16>, vector<8x8xbf16>, vector<8x8xf32> -> vector<8x8xf32>
    %c0_18 = arith.constant 0 : index
    %c0_19 = arith.constant 0 : index
    %23 = vector.load %arg16[%c0_18, %c0_19] : memref<8x4xf32, #tpu.memory_space<vmem>>, vector<8x1xf32>
    %cst_20 = arith.constant dense<0xFF800000> : vector<8xf32>
    %24 = vector.multi_reduction <maximumf>, %22, %cst_20 [1] : vector<8x8xf32> to vector<8xf32>
    %25 = vector.shape_cast %24 : vector<8xf32> to vector<8x1xf32>
    %26 = arith.maximumf %23, %25 : vector<8x1xf32>
    %27 = arith.subf %23, %26 : vector<8x1xf32>
    %28 = math.exp %27 : vector<8x1xf32>
    %29 = vector.broadcast %26 : vector<8x1xf32> to vector<8x8xf32>
    %30 = arith.subf %22, %29 : vector<8x8xf32>
    %31 = math.exp %30 : vector<8x8xf32>
    %c0_21 = arith.constant 0 : index
    %c0_22 = arith.constant 0 : index
    %32 = vector.load %arg17[%c0_21, %c0_22] : memref<8x4xf32, #tpu.memory_space<vmem>>, vector<8x1xf32>
    %33 = arith.mulf %28, %32 : vector<8x1xf32>
    %cst_23 = arith.constant dense<0.000000e+00> : vector<8xf32>
    %34 = vector.multi_reduction <add>, %31, %cst_23 [1] : vector<8x8xf32> to vector<8xf32>
    %35 = vector.shape_cast %34 : vector<8xf32> to vector<8x1xf32>
    %36 = arith.addf %33, %35 : vector<8x1xf32>
    %c0_24 = arith.constant 0 : index
    %c0_25 = arith.constant 0 : index
    %37 = vector.load %arg17[%c0_24, %c0_25] : memref<8x4xf32, #tpu.memory_space<vmem>>, vector<8x1xf32>
    tpu.vector_store %arg17[%c0_24, %c0_25], %36 {strides = array<i32>} : memref<8x4xf32, #tpu.memory_space<vmem>>, vector<8x1xf32>,
    %c0_26 = arith.constant 0 : index
    %c0_27 = arith.constant 0 : index
    %c0_28 = arith.constant 0 : index
    %38 = vector.load %arg18[%c0_26, %c0_27, %c0_28] : memref<4x8x8xf32, #tpu.memory_space<vmem>>, vector<1x8x8xf32>
    %39 = vector.shape_cast %38 : vector<1x8x8xf32> to vector<8x8xf32>
    %40 = vector.broadcast %28 : vector<8x1xf32> to vector<8x8xf32>
    %41 = arith.mulf %40, %39 : vector<8x8xf32>
    %42 = arith.truncf %31 : vector<8x8xf32> to vector<8x8xbf16>
    %cst_29 = arith.constant dense<0.000000e+00> : vector<8x8xf32>
    %43 = tpu.matmul %42, %21, %cst_29 {dimension_numbers = #tpu.dot_dimension_numbers<[1], [0], [0], [1], [0, 0, 1, 1], [], []>} : vector<8x8xbf16>, vector<8x8xbf16>, vector<8x8xf32> -> vector<8x8xf32>
    %44 = arith.addf %41, %43 : vector<8x8xf32>
    %c0_30 = arith.constant 0 : index
    %c0_31 = arith.constant 0 : index
    %c0_32 = arith.constant 0 : index
    %45 = vector.load %arg18[%c0_30, %c0_31, %c0_32] : memref<4x8x8xf32, #tpu.memory_space<vmem>>, vector<1x8x8xf32>
    %46 = vector.shape_cast %45 : vector<1x8x8xf32> to vector<8x8xf32>
    %47 = vector.shape_cast %44 : vector<8x8xf32> to vector<1x8x8xf32>
    tpu.vector_store %arg18[%c0_30, %c0_31, %c0_32], %47 {strides = array<i32>} : memref<4x8x8xf32, #tpu.memory_space<vmem>>, vector<1x8x8xf32>,
    %c0_33 = arith.constant 0 : index
    %c0_34 = arith.constant 0 : index
    %48 = vector.load %arg16[%c0_33, %c0_34] : memref<8x4xf32, #tpu.memory_space<vmem>>, vector<8x1xf32>
    tpu.vector_store %arg16[%c0_33, %c0_34], %26 {strides = array<i32>} : memref<8x4xf32, #tpu.memory_space<vmem>>, vector<8x1xf32>,
    %c0_35 = arith.constant 0 : index
    %c8 = arith.constant 8 : index
    %49 = vector.load %arg15[%c0_35, %c8] : memref<8x32xbf16, #tpu.memory_space<vmem>>, vector<8x8xbf16>
    %50 = vector.extract_strided_slice %10 {offsets = [0, 8], sizes = [8, 8], strides = [1, 1]} : vector<8x32xbf16> to vector<8x8xbf16>
    %51 = vector.extract_strided_slice %18 {offsets = [0, 8], sizes = [8, 8], strides = [1, 1]} : vector<8x32xbf16> to vector<8x8xbf16>
    %cst_36 = arith.constant dense<0.000000e+00> : vector<8x8xf32>
    %52 = tpu.matmul %49, %50, %cst_36 {dimension_numbers = #tpu.dot_dimension_numbers<[1], [1], [0], [0], [0, 0, 1, 0], [], []>} : vector<8x8xbf16>, vector<8x8xbf16>, vector<8x8xf32> -> vector<8x8xf32>
    %c0_37 = arith.constant 0 : index
    %c1 = arith.constant 1 : index
    %53 = vector.load %arg16[%c0_37, %c1] : memref<8x4xf32, #tpu.memory_space<vmem>>, vector<8x1xf32>
    %cst_38 = arith.constant dense<0xFF800000> : vector<8xf32>
    %54 = vector.multi_reduction <maximumf>, %52, %cst_38 [1] : vector<8x8xf32> to vector<8xf32>
    %55 = vector.shape_cast %54 : vector<8xf32> to vector<8x1xf32>
    %56 = arith.maximumf %53, %55 : vector<8x1xf32>
    %57 = arith.subf %53, %56 : vector<8x1xf32>
    %58 = math.exp %57 : vector<8x1xf32>
    %59 = vector.broadcast %56 : vector<8x1xf32> to vector<8x8xf32>
    %60 = arith.subf %52, %59 : vector<8x8xf32>
    %61 = math.exp %60 : vector<8x8xf32>
    %c0_39 = arith.constant 0 : index
    %c1_40 = arith.constant 1 : index
    %62 = vector.load %arg17[%c0_39, %c1_40] : memref<8x4xf32, #tpu.memory_space<vmem>>, vector<8x1xf32>
    %63 = arith.mulf %58, %62 : vector<8x1xf32>
    %cst_41 = arith.constant dense<0.000000e+00> : vector<8xf32>
    %64 = vector.multi_reduction <add>, %61, %cst_41 [1] : vector<8x8xf32> to vector<8xf32>
    %65 = vector.shape_cast %64 : vector<8xf32> to vector<8x1xf32>
    %66 = arith.addf %63, %65 : vector<8x1xf32>
    %c0_42 = arith.constant 0 : index
    %c1_43 = arith.constant 1 : index
    %67 = vector.load %arg17[%c0_42, %c1_43] : memref<8x4xf32, #tpu.memory_space<vmem>>, vector<8x1xf32>
    tpu.vector_store %arg17[%c0_42, %c1_43], %66 {strides = array<i32>} : memref<8x4xf32, #tpu.memory_space<vmem>>, vector<8x1xf32>,
    %c1_44 = arith.constant 1 : index
    %c0_45 = arith.constant 0 : index
    %c0_46 = arith.constant 0 : index
    %68 = vector.load %arg18[%c1_44, %c0_45, %c0_46] : memref<4x8x8xf32, #tpu.memory_space<vmem>>, vector<1x8x8xf32>
    %69 = vector.shape_cast %68 : vector<1x8x8xf32> to vector<8x8xf32>
    %70 = vector.broadcast %58 : vector<8x1xf32> to vector<8x8xf32>
    %71 = arith.mulf %70, %69 : vector<8x8xf32>
    %72 = arith.truncf %61 : vector<8x8xf32> to vector<8x8xbf16>
    %cst_47 = arith.constant dense<0.000000e+00> : vector<8x8xf32>
    %73 = tpu.matmul %72, %51, %cst_47 {dimension_numbers = #tpu.dot_dimension_numbers<[1], [0], [0], [1], [0, 0, 1, 1], [], []>} : vector<8x8xbf16>, vector<8x8xbf16>, vector<8x8xf32> -> vector<8x8xf32>
    %74 = arith.addf %71, %73 : vector<8x8xf32>
    %c1_48 = arith.constant 1 : index
    %c0_49 = arith.constant 0 : index
    %c0_50 = arith.constant 0 : index
    %75 = vector.load %arg18[%c1_48, %c0_49, %c0_50] : memref<4x8x8xf32, #tpu.memory_space<vmem>>, vector<1x8x8xf32>
    %76 = vector.shape_cast %75 : vector<1x8x8xf32> to vector<8x8xf32>
    %77 = vector.shape_cast %74 : vector<8x8xf32> to vector<1x8x8xf32>
    tpu.vector_store %arg18[%c1_48, %c0_49, %c0_50], %77 {strides = array<i32>} : memref<4x8x8xf32, #tpu.memory_space<vmem>>, vector<1x8x8xf32>,
    %c0_51 = arith.constant 0 : index
    %c1_52 = arith.constant 1 : index
    %78 = vector.load %arg16[%c0_51, %c1_52] : memref<8x4xf32, #tpu.memory_space<vmem>>, vector<8x1xf32>
    tpu.vector_store %arg16[%c0_51, %c1_52], %56 {strides = array<i32>} : memref<8x4xf32, #tpu.memory_space<vmem>>, vector<8x1xf32>,
    %c0_53 = arith.constant 0 : index
    %c16 = arith.constant 16 : index
    %79 = vector.load %arg15[%c0_53, %c16] : memref<8x32xbf16, #tpu.memory_space<vmem>>, vector<8x8xbf16>
    %80 = vector.extract_strided_slice %10 {offsets = [0, 16], sizes = [8, 8], strides = [1, 1]} : vector<8x32xbf16> to vector<8x8xbf16>
    %81 = vector.extract_strided_slice %18 {offsets = [0, 16], sizes = [8, 8], strides = [1, 1]} : vector<8x32xbf16> to vector<8x8xbf16>
    %cst_54 = arith.constant dense<0.000000e+00> : vector<8x8xf32>
    %82 = tpu.matmul %79, %80, %cst_54 {dimension_numbers = #tpu.dot_dimension_numbers<[1], [1], [0], [0], [0, 0, 1, 0], [], []>} : vector<8x8xbf16>, vector<8x8xbf16>, vector<8x8xf32> -> vector<8x8xf32>
    %c0_55 = arith.constant 0 : index
    %c2 = arith.constant 2 : index
    %83 = vector.load %arg16[%c0_55, %c2] : memref<8x4xf32, #tpu.memory_space<vmem>>, vector<8x1xf32>
    %cst_56 = arith.constant dense<0xFF800000> : vector<8xf32>
    %84 = vector.multi_reduction <maximumf>, %82, %cst_56 [1] : vector<8x8xf32> to vector<8xf32>
    %85 = vector.shape_cast %84 : vector<8xf32> to vector<8x1xf32>
    %86 = arith.maximumf %83, %85 : vector<8x1xf32>
    %87 = arith.subf %83, %86 : vector<8x1xf32>
    %88 = math.exp %87 : vector<8x1xf32>
    %89 = vector.broadcast %86 : vector<8x1xf32> to vector<8x8xf32>
    %90 = arith.subf %82, %89 : vector<8x8xf32>
    %91 = math.exp %90 : vector<8x8xf32>
    %c0_57 = arith.constant 0 : index
    %c2_58 = arith.constant 2 : index
    %92 = vector.load %arg17[%c0_57, %c2_58] : memref<8x4xf32, #tpu.memory_space<vmem>>, vector<8x1xf32>
    %93 = arith.mulf %88, %92 : vector<8x1xf32>
    %cst_59 = arith.constant dense<0.000000e+00> : vector<8xf32>
    %94 = vector.multi_reduction <add>, %91, %cst_59 [1] : vector<8x8xf32> to vector<8xf32>
    %95 = vector.shape_cast %94 : vector<8xf32> to vector<8x1xf32>
    %96 = arith.addf %93, %95 : vector<8x1xf32>
    %c0_60 = arith.constant 0 : index
    %c2_61 = arith.constant 2 : index
    %97 = vector.load %arg17[%c0_60, %c2_61] : memref<8x4xf32, #tpu.memory_space<vmem>>, vector<8x1xf32>
    tpu.vector_store %arg17[%c0_60, %c2_61], %96 {strides = array<i32>} : memref<8x4xf32, #tpu.memory_space<vmem>>, vector<8x1xf32>,
    %c2_62 = arith.constant 2 : index
    %c0_63 = arith.constant 0 : index
    %c0_64 = arith.constant 0 : index
    %98 = vector.load %arg18[%c2_62, %c0_63, %c0_64] : memref<4x8x8xf32, #tpu.memory_space<vmem>>, vector<1x8x8xf32>
    %99 = vector.shape_cast %98 : vector<1x8x8xf32> to vector<8x8xf32>
    %100 = vector.broadcast %88 : vector<8x1xf32> to vector<8x8xf32>
    %101 = arith.mulf %100, %99 : vector<8x8xf32>
    %102 = arith.truncf %91 : vector<8x8xf32> to vector<8x8xbf16>
    %cst_65 = arith.constant dense<0.000000e+00> : vector<8x8xf32>
    %103 = tpu.matmul %102, %81, %cst_65 {dimension_numbers = #tpu.dot_dimension_numbers<[1], [0], [0], [1], [0, 0, 1, 1], [], []>} : vector<8x8xbf16>, vector<8x8xbf16>, vector<8x8xf32> -> vector<8x8xf32>
    %104 = arith.addf %101, %103 : vector<8x8xf32>
    %c2_66 = arith.constant 2 : index
    %c0_67 = arith.constant 0 : index
    %c0_68 = arith.constant 0 : index
    %105 = vector.load %arg18[%c2_66, %c0_67, %c0_68] : memref<4x8x8xf32, #tpu.memory_space<vmem>>, vector<1x8x8xf32>
    %106 = vector.shape_cast %105 : vector<1x8x8xf32> to vector<8x8xf32>
    %107 = vector.shape_cast %104 : vector<8x8xf32> to vector<1x8x8xf32>
    tpu.vector_store %arg18[%c2_66, %c0_67, %c0_68], %107 {strides = array<i32>} : memref<4x8x8xf32, #tpu.memory_space<vmem>>, vector<1x8x8xf32>,
    %c0_69 = arith.constant 0 : index
    %c2_70 = arith.constant 2 : index
    %108 = vector.load %arg16[%c0_69, %c2_70] : memref<8x4xf32, #tpu.memory_space<vmem>>, vector<8x1xf32>
    tpu.vector_store %arg16[%c0_69, %c2_70], %86 {strides = array<i32>} : memref<8x4xf32, #tpu.memory_space<vmem>>, vector<8x1xf32>,
    %c0_71 = arith.constant 0 : index
    %c24 = arith.constant 24 : index
    %109 = vector.load %arg15[%c0_71, %c24] : memref<8x32xbf16, #tpu.memory_space<vmem>>, vector<8x8xbf16>
    %110 = vector.extract_strided_slice %10 {offsets = [0, 24], sizes = [8, 8], strides = [1, 1]} : vector<8x32xbf16> to vector<8x8xbf16>
    %111 = vector.extract_strided_slice %18 {offsets = [0, 24], sizes = [8, 8], strides = [1, 1]} : vector<8x32xbf16> to vector<8x8xbf16>
    %cst_72 = arith.constant dense<0.000000e+00> : vector<8x8xf32>
    %112 = tpu.matmul %109, %110, %cst_72 {dimension_numbers = #tpu.dot_dimension_numbers<[1], [1], [0], [0], [0, 0, 1, 0], [], []>} : vector<8x8xbf16>, vector<8x8xbf16>, vector<8x8xf32> -> vector<8x8xf32>
    %c0_73 = arith.constant 0 : index
    %c3 = arith.constant 3 : index
    %113 = vector.load %arg16[%c0_73, %c3] : memref<8x4xf32, #tpu.memory_space<vmem>>, vector<8x1xf32>
    %cst_74 = arith.constant dense<0xFF800000> : vector<8xf32>
    %114 = vector.multi_reduction <maximumf>, %112, %cst_74 [1] : vector<8x8xf32> to vector<8xf32>
    %115 = vector.shape_cast %114 : vector<8xf32> to vector<8x1xf32>
    %116 = arith.maximumf %113, %115 : vector<8x1xf32>
    %117 = arith.subf %113, %116 : vector<8x1xf32>
    %118 = math.exp %117 : vector<8x1xf32>
    %119 = vector.broadcast %116 : vector<8x1xf32> to vector<8x8xf32>
    %120 = arith.subf %112, %119 : vector<8x8xf32>
    %121 = math.exp %120 : vector<8x8xf32>
    %c0_75 = arith.constant 0 : index
    %c3_76 = arith.constant 3 : index
    %122 = vector.load %arg17[%c0_75, %c3_76] : memref<8x4xf32, #tpu.memory_space<vmem>>, vector<8x1xf32>
    %123 = arith.mulf %118, %122 : vector<8x1xf32>
    %cst_77 = arith.constant dense<0.000000e+00> : vector<8xf32>
    %124 = vector.multi_reduction <add>, %121, %cst_77 [1] : vector<8x8xf32> to vector<8xf32>
    %125 = vector.shape_cast %124 : vector<8xf32> to vector<8x1xf32>
    %126 = arith.addf %123, %125 : vector<8x1xf32>
    %c0_78 = arith.constant 0 : index
    %c3_79 = arith.constant 3 : index
    %127 = vector.load %arg17[%c0_78, %c3_79] : memref<8x4xf32, #tpu.memory_space<vmem>>, vector<8x1xf32>
    tpu.vector_store %arg17[%c0_78, %c3_79], %126 {strides = array<i32>} : memref<8x4xf32, #tpu.memory_space<vmem>>, vector<8x1xf32>,
    %c3_80 = arith.constant 3 : index
    %c0_81 = arith.constant 0 : index
    %c0_82 = arith.constant 0 : index
    %128 = vector.load %arg18[%c3_80, %c0_81, %c0_82] : memref<4x8x8xf32, #tpu.memory_space<vmem>>, vector<1x8x8xf32>
    %129 = vector.shape_cast %128 : vector<1x8x8xf32> to vector<8x8xf32>
    %130 = vector.broadcast %118 : vector<8x1xf32> to vector<8x8xf32>
    %131 = arith.mulf %130, %129 : vector<8x8xf32>
    %132 = arith.truncf %121 : vector<8x8xf32> to vector<8x8xbf16>
    %cst_83 = arith.constant dense<0.000000e+00> : vector<8x8xf32>
    %133 = tpu.matmul %132, %111, %cst_83 {dimension_numbers = #tpu.dot_dimension_numbers<[1], [0], [0], [1], [0, 0, 1, 1], [], []>} : vector<8x8xbf16>, vector<8x8xbf16>, vector<8x8xf32> -> vector<8x8xf32>
    %134 = arith.addf %131, %133 : vector<8x8xf32>
    %c3_84 = arith.constant 3 : index
    %c0_85 = arith.constant 0 : index
    %c0_86 = arith.constant 0 : index
    %135 = vector.load %arg18[%c3_84, %c0_85, %c0_86] : memref<4x8x8xf32, #tpu.memory_space<vmem>>, vector<1x8x8xf32>
    %136 = vector.shape_cast %135 : vector<1x8x8xf32> to vector<8x8xf32>
    %137 = vector.shape_cast %134 : vector<8x8xf32> to vector<1x8x8xf32>
    tpu.vector_store %arg18[%c3_84, %c0_85, %c0_86], %137 {strides = array<i32>} : memref<4x8x8xf32, #tpu.memory_space<vmem>>, vector<1x8x8xf32>,
    %c0_87 = arith.constant 0 : index
    %c3_88 = arith.constant 3 : index
    %138 = vector.load %arg16[%c0_87, %c3_88] : memref<8x4xf32, #tpu.memory_space<vmem>>, vector<8x1xf32>
    tpu.vector_store %arg16[%c0_87, %c3_88], %116 {strides = array<i32>} : memref<8x4xf32, #tpu.memory_space<vmem>>, vector<8x1xf32>,
    %c0_i32_89 = arith.constant 0 : i32
    %139 = arith.cmpi eq, %arg2, %c0_i32_89 : i32
    %140 = arith.extui %139 : i1 to i32
    %c0_i32_90 = arith.constant 0 : i32
    %141 = arith.cmpi ne, %140, %c0_i32_90 : i32
    scf.if %141 {
      %cst_91 = arith.constant 0.000000e+00 : f32
      %142 = vector.broadcast %cst_91 : f32 to vector<8x32xf32>
      %c0_92 = arith.constant 0 : index
      %c0_93 = arith.constant 0 : index
      %143 = vector.load %arg17[%c0_92, %c0_93] : memref<8x4xf32, #tpu.memory_space<vmem>>, vector<8x1xf32>
      %144 = tpu.reciprocal %143 {approx = true} : vector<8x1xf32> -> vector<8x1xf32>
      %c0_94 = arith.constant 0 : index
      %c0_95 = arith.constant 0 : index
      %c0_96 = arith.constant 0 : index
      %145 = vector.load %arg18[%c0_94, %c0_95, %c0_96] : memref<4x8x8xf32, #tpu.memory_space<vmem>>, vector<1x8x8xf32>
      %146 = vector.shape_cast %145 : vector<1x8x8xf32> to vector<8x8xf32>
      %147 = vector.broadcast %144 : vector<8x1xf32> to vector<8x8xf32>
      %148 = arith.mulf %146, %147 : vector<8x8xf32>
      %149 = arith.truncf %148 : vector<8x8xf32> to vector<8x8xbf16>
      %c0_97 = arith.constant 0 : index
      %c0_98 = arith.constant 0 : index
      %150 = vector.load %arg9[%c0_97, %c0_98] : memref<32x32xbf16, #tpu.memory_space<vmem>>, vector<8x32xbf16>
      %cst_99 = arith.constant dense<0.000000e+00> : vector<8x32xf32>
      %151 = tpu.matmul %149, %150, %cst_99 {dimension_numbers = #tpu.dot_dimension_numbers<[1], [0], [0], [1], [0, 0, 1, 1], [], []>} : vector<8x8xbf16>, vector<8x32xbf16>, vector<8x32xf32> -> vector<8x32xf32>
      %152 = arith.addf %142, %151 : vector<8x32xf32>
      %c0_100 = arith.constant 0 : index
      %c1_101 = arith.constant 1 : index
      %153 = vector.load %arg17[%c0_100, %c1_101] : memref<8x4xf32, #tpu.memory_space<vmem>>, vector<8x1xf32>
      %154 = tpu.reciprocal %153 {approx = true} : vector<8x1xf32> -> vector<8x1xf32>
      %c1_102 = arith.constant 1 : index
      %c0_103 = arith.constant 0 : index
      %c0_104 = arith.constant 0 : index
      %155 = vector.load %arg18[%c1_102, %c0_103, %c0_104] : memref<4x8x8xf32, #tpu.memory_space<vmem>>, vector<1x8x8xf32>
      %156 = vector.shape_cast %155 : vector<1x8x8xf32> to vector<8x8xf32>
      %157 = vector.broadcast %154 : vector<8x1xf32> to vector<8x8xf32>
      %158 = arith.mulf %156, %157 : vector<8x8xf32>
      %159 = arith.truncf %158 : vector<8x8xf32> to vector<8x8xbf16>
      %c8_105 = arith.constant 8 : index
      %c0_106 = arith.constant 0 : index
      %160 = vector.load %arg9[%c8_105, %c0_106] : memref<32x32xbf16, #tpu.memory_space<vmem>>, vector<8x32xbf16>
      %cst_107 = arith.constant dense<0.000000e+00> : vector<8x32xf32>
      %161 = tpu.matmul %159, %160, %cst_107 {dimension_numbers = #tpu.dot_dimension_numbers<[1], [0], [0], [1], [0, 0, 1, 1], [], []>} : vector<8x8xbf16>, vector<8x32xbf16>, vector<8x32xf32> -> vector<8x32xf32>
      %162 = arith.addf %152, %161 : vector<8x32xf32>
      %c0_108 = arith.constant 0 : index
      %c2_109 = arith.constant 2 : index
      %163 = vector.load %arg17[%c0_108, %c2_109] : memref<8x4xf32, #tpu.memory_space<vmem>>, vector<8x1xf32>
      %164 = tpu.reciprocal %163 {approx = true} : vector<8x1xf32> -> vector<8x1xf32>
      %c2_110 = arith.constant 2 : index
      %c0_111 = arith.constant 0 : index
      %c0_112 = arith.constant 0 : index
      %165 = vector.load %arg18[%c2_110, %c0_111, %c0_112] : memref<4x8x8xf32, #tpu.memory_space<vmem>>, vector<1x8x8xf32>
      %166 = vector.shape_cast %165 : vector<1x8x8xf32> to vector<8x8xf32>
      %167 = vector.broadcast %164 : vector<8x1xf32> to vector<8x8xf32>
      %168 = arith.mulf %166, %167 : vector<8x8xf32>
      %169 = arith.truncf %168 : vector<8x8xf32> to vector<8x8xbf16>
      %c16_113 = arith.constant 16 : index
      %c0_114 = arith.constant 0 : index
      %170 = vector.load %arg9[%c16_113, %c0_114] : memref<32x32xbf16, #tpu.memory_space<vmem>>, vector<8x32xbf16>
      %cst_115 = arith.constant dense<0.000000e+00> : vector<8x32xf32>
      %171 = tpu.matmul %169, %170, %cst_115 {dimension_numbers = #tpu.dot_dimension_numbers<[1], [0], [0], [1], [0, 0, 1, 1], [], []>} : vector<8x8xbf16>, vector<8x32xbf16>, vector<8x32xf32> -> vector<8x32xf32>
      %172 = arith.addf %162, %171 : vector<8x32xf32>
      %c0_116 = arith.constant 0 : index
      %c3_117 = arith.constant 3 : index
      %173 = vector.load %arg17[%c0_116, %c3_117] : memref<8x4xf32, #tpu.memory_space<vmem>>, vector<8x1xf32>
      %174 = tpu.reciprocal %173 {approx = true} : vector<8x1xf32> -> vector<8x1xf32>
      %c3_118 = arith.constant 3 : index
      %c0_119 = arith.constant 0 : index
      %c0_120 = arith.constant 0 : index
      %175 = vector.load %arg18[%c3_118, %c0_119, %c0_120] : memref<4x8x8xf32, #tpu.memory_space<vmem>>, vector<1x8x8xf32>
      %176 = vector.shape_cast %175 : vector<1x8x8xf32> to vector<8x8xf32>
      %177 = vector.broadcast %174 : vector<8x1xf32> to vector<8x8xf32>
      %178 = arith.mulf %176, %177 : vector<8x8xf32>
      %179 = arith.truncf %178 : vector<8x8xf32> to vector<8x8xbf16>
      %c24_121 = arith.constant 24 : index
      %c0_122 = arith.constant 0 : index
      %180 = vector.load %arg9[%c24_121, %c0_122] : memref<32x32xbf16, #tpu.memory_space<vmem>>, vector<8x32xbf16>
      %cst_123 = arith.constant dense<0.000000e+00> : vector<8x32xf32>
      %181 = tpu.matmul %179, %180, %cst_123 {dimension_numbers = #tpu.dot_dimension_numbers<[1], [0], [0], [1], [0, 0, 1, 1], [], []>} : vector<8x8xbf16>, vector<8x32xbf16>, vector<8x32xf32> -> vector<8x32xf32>
      %182 = arith.addf %172, %181 : vector<8x32xf32>
      %c0_124 = arith.constant 0 : index
      %c0_125 = arith.constant 0 : index
      %183 = vector.load %arg13[%c0_124, %c0_125] : memref<1x32xf32, #tpu.memory_space<vmem>>, vector<1x32xf32>
      %184 = vector.broadcast %183 : vector<1x32xf32> to vector<8x32xf32>
      %185 = arith.addf %182, %184 : vector<8x32xf32>
      %c0_126 = arith.constant 0 : index
      %c0_127 = arith.constant 0 : index
      %c0_128 = arith.constant 0 : index
      %186 = vector.load %arg14[%c0_126, %c0_127, %c0_128] : memref<1x8x32xf32, #tpu.memory_space<vmem>>, vector<1x8x32xf32>
      %187 = vector.shape_cast %186 : vector<1x8x32xf32> to vector<8x32xf32>
      %188 = vector.shape_cast %185 : vector<8x32xf32> to vector<1x8x32xf32>
      tpu.vector_store %arg14[%c0_126, %c0_127, %c0_128], %188 {strides = array<i32>} : memref<1x8x32xf32, #tpu.memory_space<vmem>>, vector<1x8x32xf32>,
    } else {
    }
    return
  }
  func.func @transform_0(%arg0: i32, %arg1: i32, %arg2: i32) -> (i32, i32, i32) {
    %c0_i32 = arith.constant 0 : i32
    %c0_i32_0 = arith.constant 0 : i32
    return %arg0, %arg1, %c0_i32 : i32, i32, i32
  }
  func.func @transform_1(%arg0: i32, %arg1: i32, %arg2: i32) -> (i32, i32, i32) {
    %c0_i32 = arith.constant 0 : i32
    %c0_i32_0 = arith.constant 0 : i32
    return %arg0, %arg2, %c0_i32 : i32, i32, i32
  }
  func.func @transform_2(%arg0: i32, %arg1: i32, %arg2: i32) -> (i32, i32, i32) {
    %c0_i32 = arith.constant 0 : i32
    %c0_i32_0 = arith.constant 0 : i32
    return %arg0, %arg2, %c0_i32 : i32, i32, i32
  }
  func.func @transform_3(%arg0: i32, %arg1: i32, %arg2: i32) -> (i32, i32) {
    %c0_i32 = arith.constant 0 : i32
    %c0_i32_0 = arith.constant 0 : i32
    %c0_i32_1 = arith.constant 0 : i32
    return %c0_i32, %c0_i32_0 : i32, i32
  }
  func.func @transform_4(%arg0: i32, %arg1: i32, %arg2: i32) -> (i32, i32) {
    %c0_i32 = arith.constant 0 : i32
    %c0_i32_0 = arith.constant 0 : i32
    %c0_i32_1 = arith.constant 0 : i32
    return %c0_i32, %c0_i32_0 : i32, i32
  }
  func.func @transform_5(%arg0: i32, %arg1: i32, %arg2: i32) -> (i32, i32) {
    %c0_i32 = arith.constant 0 : i32
    %c0_i32_0 = arith.constant 0 : i32
    %c0_i32_1 = arith.constant 0 : i32
    return %c0_i32, %c0_i32_0 : i32, i32
  }
  func.func @transform_6(%arg0: i32, %arg1: i32, %arg2: i32) -> (i32, i32) {
    %c0_i32 = arith.constant 0 : i32
    %c0_i32_0 = arith.constant 0 : i32
    %c0_i32_1 = arith.constant 0 : i32
    return %c0_i32, %c0_i32_0 : i32, i32
  }
  func.func @transform_7(%arg0: i32, %arg1: i32, %arg2: i32) -> (i32, i32) {
    %c0_i32 = arith.constant 0 : i32
    %c0_i32_0 = arith.constant 0 : i32
    %c0_i32_1 = arith.constant 0 : i32
    return %c0_i32, %c0_i32_0 : i32, i32
  }
  func.func @transform_8(%arg0: i32, %arg1: i32, %arg2: i32) -> (i32, i32) {
    %c0_i32 = arith.constant 0 : i32
    %c0_i32_0 = arith.constant 0 : i32
    %c0_i32_1 = arith.constant 0 : i32
    return %c0_i32, %c0_i32_0 : i32, i32
  }
  func.func @transform_9(%arg0: i32, %arg1: i32, %arg2: i32) -> (i32, i32) {
    %c0_i32 = arith.constant 0 : i32
    %c0_i32_0 = arith.constant 0 : i32
    %c0_i32_1 = arith.constant 0 : i32
    return %c0_i32, %c0_i32_0 : i32, i32
  }
  func.func @transform_10(%arg0: i32, %arg1: i32, %arg2: i32) -> (i32, i32) {
    %c0_i32 = arith.constant 0 : i32
    %c0_i32_0 = arith.constant 0 : i32
    %c0_i32_1 = arith.constant 0 : i32
    return %c0_i32, %c0_i32_0 : i32, i32
  }
  func.func @transform_11(%arg0: i32, %arg1: i32, %arg2: i32) -> (i32, i32, i32) {
    %c0_i32 = arith.constant 0 : i32
    %c0_i32_0 = arith.constant 0 : i32
    return %arg0, %arg1, %c0_i32 : i32, i32, i32
  }
}

module attributes {stable_mosaic.version = 11 : i64} {
  func.func @mha_flash_kernel(%arg0: i32, %arg1: i32, %arg2: i32, %arg3: memref<1x8x32xbf16, #tpu.memory_space<vmem>>, %arg4: memref<1x8x32xbf16, #tpu.memory_space<vmem>>, %arg5: memref<1x8x32xbf16, #tpu.memory_space<vmem>>, %arg6: memref<32x32xbf16, #tpu.memory_space<vmem>>, %arg7: memref<32x32xbf16, #tpu.memory_space<vmem>>, %arg8: memref<32x32xbf16, #tpu.memory_space<vmem>>, %arg9: memref<32x32xbf16, #tpu.memory_space<vmem>>, %arg10: memref<1x32xf32, #tpu.memory_space<vmem>>, %arg11: memref<1x32xf32, #tpu.memory_space<vmem>>, %arg12: memref<1x32xf32, #tpu.memory_space<vmem>>, %arg13: memref<1x32xf32, #tpu.memory_space<vmem>>, %arg14: memref<1x8x32xf32, #tpu.memory_space<vmem>>, %arg15: memref<8x32xbf16, #tpu.memory_space<vmem>>, %arg16: memref<8x4xf32, #tpu.memory_space<vmem>>, %arg17: memref<8x4xf32, #tpu.memory_space<vmem>>, %arg18: memref<4x8x8xf32, #tpu.memory_space<vmem>>) attributes {dimension_semantics = [#tpu.dimension_semantics<parallel>, #tpu.dimension_semantics<parallel>, #tpu.dimension_semantics<arbitrary>], iteration_bounds = array<i64: 2, 1, 1>, scalar_prefetch = 0 : i64, scratch_operands = 4 : i64, tpu.core_type = #tpu.core_type<tc>, window_params = [{transform_indices = @transform_0, window_bounds = array<i64: 1, 8, 32>}, {transform_indices = @transform_1, window_bounds = array<i64: 1, 8, 32>}, {transform_indices = @transform_2, window_bounds = array<i64: 1, 8, 32>}, {pipeline_mode = #tpu.pipeline_mode<synchronous>, transform_indices = @transform_3, window_bounds = array<i64: 32, 32>}, {pipeline_mode = #tpu.pipeline_mode<synchronous>, transform_indices = @transform_4, window_bounds = array<i64: 32, 32>}, {pipeline_mode = #tpu.pipeline_mode<synchronous>, transform_indices = @transform_5, window_bounds = array<i64: 32, 32>}, {pipeline_mode = #tpu.pipeline_mode<synchronous>, transform_indices = @transform_6, window_bounds = array<i64: 32, 32>}, {pipeline_mode = #tpu.pipeline_mode<synchronous>, transform_indices = @transform_7, window_bounds = array<i64: 1, 32>}, {pipeline_mode = #tpu.pipeline_mode<synchronous>, transform_indices = @transform_8, window_bounds = array<i64: 1, 32>}, {pipeline_mode = #tpu.pipeline_mode<synchronous>, transform_indices = @transform_9, window_bounds = array<i64: 1, 32>}, {pipeline_mode = #tpu.pipeline_mode<synchronous>, transform_indices = @transform_10, window_bounds = array<i64: 1, 32>}, {transform_indices = @transform_11, window_bounds = array<i64: 1, 8, 32>}]} {
    %c0_i32 = arith.constant 0 : i32
    %0 = arith.cmpi eq, %arg2, %c0_i32 : i32
    %1 = arith.extui %0 : i1 to i32
    %c0_i32_0 = arith.constant 0 : i32
    %2 = arith.cmpi ne, %1, %c0_i32_0 : i32
    scf.if %2 {
      %c0_91 = arith.constant 0 : index
      %c0_92 = arith.constant 0 : index
      %c0_93 = arith.constant 0 : index
      %142 = vector.load %arg3[%c0_91, %c0_92, %c0_93] : memref<1x8x32xbf16, #tpu.memory_space<vmem>>, vector<1x8x32xbf16>
      %143 = vector.shape_cast %142 : vector<1x8x32xbf16> to vector<8x32xbf16>
      %c0_94 = arith.constant 0 : index
      %c0_95 = arith.constant 0 : index
      %144 = vector.load %arg6[%c0_94, %c0_95] : memref<32x32xbf16, #tpu.memory_space<vmem>>, vector<32x32xbf16>
      %cst_96 = arith.constant dense<0.000000e+00> : vector<8x32xf32>
      %145 = tpu.matmul %143, %144, %cst_96 {dimension_numbers = #tpu.dot_dimension_numbers<[1], [0], [0], [1], [0, 0, 1, 1], [], []>} : vector<8x32xbf16>, vector<32x32xbf16>, vector<8x32xf32> -> vector<8x32xf32>
      %c0_97 = arith.constant 0 : index
      %c0_98 = arith.constant 0 : index
      %146 = vector.load %arg10[%c0_97, %c0_98] : memref<1x32xf32, #tpu.memory_space<vmem>>, vector<1x32xf32>
      %147 = vector.broadcast %146 : vector<1x32xf32> to vector<8x32xf32>
      %148 = arith.addf %145, %147 : vector<8x32xf32>
      %149 = arith.truncf %148 : vector<8x32xf32> to vector<8x32xbf16>
      %c0_99 = arith.constant 0 : index
      %c0_100 = arith.constant 0 : index
      %150 = vector.load %arg15[%c0_99, %c0_100] : memref<8x32xbf16, #tpu.memory_space<vmem>>, vector<8x32xbf16>
      tpu.vector_store %arg15[%c0_99, %c0_100], %149 {strides = array<i32>} : memref<8x32xbf16, #tpu.memory_space<vmem>>, vector<8x32xbf16>,
      %cst_101 = arith.constant 0xFF800000 : f32
      %151 = vector.broadcast %cst_101 : f32 to vector<8x4xf32>
      %c0_102 = arith.constant 0 : index
      %c0_103 = arith.constant 0 : index
      %152 = vector.load %arg16[%c0_102, %c0_103] : memref<8x4xf32, #tpu.memory_space<vmem>>, vector<8x4xf32>
      tpu.vector_store %arg16[%c0_102, %c0_103], %151 {strides = array<i32>} : memref<8x4xf32, #tpu.memory_space<vmem>>, vector<8x4xf32>,
      %cst_104 = arith.constant 0.000000e+00 : f32
      %153 = vector.broadcast %cst_104 : f32 to vector<8x4xf32>
      %c0_105 = arith.constant 0 : index
      %c0_106 = arith.constant 0 : index
      %154 = vector.load %arg17[%c0_105, %c0_106] : memref<8x4xf32, #tpu.memory_space<vmem>>, vector<8x4xf32>
      tpu.vector_store %arg17[%c0_105, %c0_106], %153 {strides = array<i32>} : memref<8x4xf32, #tpu.memory_space<vmem>>, vector<8x4xf32>,
      %cst_107 = arith.constant 0.000000e+00 : f32
      %155 = vector.broadcast %cst_107 : f32 to vector<4x8x8xf32>
      %c0_108 = arith.constant 0 : index
      %c0_109 = arith.constant 0 : index
      %c0_110 = arith.constant 0 : index
      %156 = vector.load %arg18[%c0_108, %c0_109, %c0_110] : memref<4x8x8xf32, #tpu.memory_space<vmem>>, vector<4x8x8xf32>
      tpu.vector_store %arg18[%c0_108, %c0_109, %c0_110], %155 {strides = array<i32>} : memref<4x8x8xf32, #tpu.memory_space<vmem>>, vector<4x8x8xf32>,
    } else {
    }
    %c0 = arith.constant 0 : index
    %c0_1 = arith.constant 0 : index
    %c0_2 = arith.constant 0 : index
    %3 = vector.load %arg4[%c0, %c0_1, %c0_2] : memref<1x8x32xbf16, #tpu.memory_space<vmem>>, vector<1x8x32xbf16>
    %4 = vector.shape_cast %3 : vector<1x8x32xbf16> to vector<8x32xbf16>
    %c0_3 = arith.constant 0 : index
    %c0_4 = arith.constant 0 : index
    %5 = vector.load %arg7[%c0_3, %c0_4] : memref<32x32xbf16, #tpu.memory_space<vmem>>, vector<32x32xbf16>
    %cst = arith.constant dense<0.000000e+00> : vector<8x32xf32>
    %6 = tpu.matmul %4, %5, %cst {dimension_numbers = #tpu.dot_dimension_numbers<[1], [0], [0], [1], [0, 0, 1, 1], [], []>} : vector<8x32xbf16>, vector<32x32xbf16>, vector<8x32xf32> -> vector<8x32xf32>
    %c0_5 = arith.constant 0 : index
    %c0_6 = arith.constant 0 : index
    %7 = vector.load %arg11[%c0_5, %c0_6] : memref<1x32xf32, #tpu.memory_space<vmem>>, vector<1x32xf32>
    %8 = vector.broadcast %7 : vector<1x32xf32> to vector<8x32xf32>
    %9 = arith.addf %6, %8 : vector<8x32xf32>
    %10 = arith.truncf %9 : vector<8x32xf32> to vector<8x32xbf16>
    %c0_7 = arith.constant 0 : index
    %c0_8 = arith.constant 0 : index
    %c0_9 = arith.constant 0 : index
    %11 = vector.load %arg5[%c0_7, %c0_8, %c0_9] : memref<1x8x32xbf16, #tpu.memory_space<vmem>>, vector<1x8x32xbf16>
    %12 = vector.shape_cast %11 : vector<1x8x32xbf16> to vector<8x32xbf16>
    %c0_10 = arith.constant 0 : index
    %c0_11 = arith.constant 0 : index
    %13 = vector.load %arg8[%c0_10, %c0_11] : memref<32x32xbf16, #tpu.memory_space<vmem>>, vector<32x32xbf16>
    %cst_12 = arith.constant dense<0.000000e+00> : vector<8x32xf32>
    %14 = tpu.matmul %12, %13, %cst_12 {dimension_numbers = #tpu.dot_dimension_numbers<[1], [0], [0], [1], [0, 0, 1, 1], [], []>} : vector<8x32xbf16>, vector<32x32xbf16>, vector<8x32xf32> -> vector<8x32xf32>
    %c0_13 = arith.constant 0 : index
    %c0_14 = arith.constant 0 : index
    %15 = vector.load %arg12[%c0_13, %c0_14] : memref<1x32xf32, #tpu.memory_space<vmem>>, vector<1x32xf32>
    %16 = vector.broadcast %15 : vector<1x32xf32> to vector<8x32xf32>
    %17 = arith.addf %14, %16 : vector<8x32xf32>
    %18 = arith.truncf %17 : vector<8x32xf32> to vector<8x32xbf16>
    %c0_15 = arith.constant 0 : index
    %c0_16 = arith.constant 0 : index
    %19 = vector.load %arg15[%c0_15, %c0_16] : memref<8x32xbf16, #tpu.memory_space<vmem>>, vector<8x8xbf16>
    %20 = vector.extract_strided_slice %10 {offsets = [0, 0], sizes = [8, 8], strides = [1, 1]} : vector<8x32xbf16> to vector<8x8xbf16>
    %21 = vector.extract_strided_slice %18 {offsets = [0, 0], sizes = [8, 8], strides = [1, 1]} : vector<8x32xbf16> to vector<8x8xbf16>
    %cst_17 = arith.constant dense<0.000000e+00> : vector<8x8xf32>
    %22 = tpu.matmul %19, %20, %cst_17 {dimension_numbers = #tpu.dot_dimension_numbers<[1], [1], [0], [0], [0, 0, 1, 0], [], []>} : vector<8x8xbf16>, vector<8x8xbf16>, vector<8x8xf32> -> vector<8x8xf32>
    %c0_18 = arith.constant 0 : index
    %c0_19 = arith.constant 0 : index
    %23 = vector.load %arg16[%c0_18, %c0_19] : memref<8x4xf32, #tpu.memory_space<vmem>>, vector<8x1xf32>
    %cst_20 = arith.constant dense<0xFF800000> : vector<8xf32>
    %24 = vector.multi_reduction <maximumf>, %22, %cst_20 [1] : vector<8x8xf32> to vector<8xf32>
    %25 = vector.shape_cast %24 : vector<8xf32> to vector<8x1xf32>
    %26 = arith.maximumf %23, %25 : vector<8x1xf32>
    %27 = arith.subf %23, %26 : vector<8x1xf32>
    %28 = math.exp %27 : vector<8x1xf32>
    %29 = vector.broadcast %26 : vector<8x1xf32> to vector<8x8xf32>
    %30 = arith.subf %22, %29 : vector<8x8xf32>
    %31 = math.exp %30 : vector<8x8xf32>
    %c0_21 = arith.constant 0 : index
    %c0_22 = arith.constant 0 : index
    %32 = vector.load %arg17[%c0_21, %c0_22] : memref<8x4xf32, #tpu.memory_space<vmem>>, vector<8x1xf32>
    %33 = arith.mulf %28, %32 : vector<8x1xf32>
    %cst_23 = arith.constant dense<0.000000e+00> : vector<8xf32>
    %34 = vector.multi_reduction <add>, %31, %cst_23 [1] : vector<8x8xf32> to vector<8xf32>
    %35 = vector.shape_cast %34 : vector<8xf32> to vector<8x1xf32>
    %36 = arith.addf %33, %35 : vector<8x1xf32>
    %c0_24 = arith.constant 0 : index
    %c0_25 = arith.constant 0 : index
    %37 = vector.load %arg17[%c0_24, %c0_25] : memref<8x4xf32, #tpu.memory_space<vmem>>, vector<8x1xf32>
    tpu.vector_store %arg17[%c0_24, %c0_25], %36 {strides = array<i32>} : memref<8x4xf32, #tpu.memory_space<vmem>>, vector<8x1xf32>,
    %c0_26 = arith.constant 0 : index
    %c0_27 = arith.constant 0 : index
    %c0_28 = arith.constant 0 : index
    %38 = vector.load %arg18[%c0_26, %c0_27, %c0_28] : memref<4x8x8xf32, #tpu.memory_space<vmem>>, vector<1x8x8xf32>
    %39 = vector.shape_cast %38 : vector<1x8x8xf32> to vector<8x8xf32>
    %40 = vector.broadcast %28 : vector<8x1xf32> to vector<8x8xf32>
    %41 = arith.mulf %40, %39 : vector<8x8xf32>
    %42 = arith.truncf %31 : vector<8x8xf32> to vector<8x8xbf16>
    %cst_29 = arith.constant dense<0.000000e+00> : vector<8x8xf32>
    %43 = tpu.matmul %42, %21, %cst_29 {dimension_numbers = #tpu.dot_dimension_numbers<[1], [0], [0], [1], [0, 0, 1, 1], [], []>} : vector<8x8xbf16>, vector<8x8xbf16>, vector<8x8xf32> -> vector<8x8xf32>
    %44 = arith.addf %41, %43 : vector<8x8xf32>
    %c0_30 = arith.constant 0 : index
    %c0_31 = arith.constant 0 : index
    %c0_32 = arith.constant 0 : index
    %45 = vector.load %arg18[%c0_30, %c0_31, %c0_32] : memref<4x8x8xf32, #tpu.memory_space<vmem>>, vector<1x8x8xf32>
    %46 = vector.shape_cast %45 : vector<1x8x8xf32> to vector<8x8xf32>
    %47 = vector.shape_cast %44 : vector<8x8xf32> to vector<1x8x8xf32>
    tpu.vector_store %arg18[%c0_30, %c0_31, %c0_32], %47 {strides = array<i32>} : memref<4x8x8xf32, #tpu.memory_space<vmem>>, vector<1x8x8xf32>,
    %c0_33 = arith.constant 0 : index
    %c0_34 = arith.constant 0 : index
    %48 = vector.load %arg16[%c0_33, %c0_34] : memref<8x4xf32, #tpu.memory_space<vmem>>, vector<8x1xf32>
    tpu.vector_store %arg16[%c0_33, %c0_34], %26 {strides = array<i32>} : memref<8x4xf32, #tpu.memory_space<vmem>>, vector<8x1xf32>,
    %c0_35 = arith.constant 0 : index
    %c8 = arith.constant 8 : index
    %49 = vector.load %arg15[%c0_35, %c8] : memref<8x32xbf16, #tpu.memory_space<vmem>>, vector<8x8xbf16>
    %50 = vector.extract_strided_slice %10 {offsets = [0, 8], sizes = [8, 8], strides = [1, 1]} : vector<8x32xbf16> to vector<8x8xbf16>
    %51 = vector.extract_strided_slice %18 {offsets = [0, 8], sizes = [8, 8], strides = [1, 1]} : vector<8x32xbf16> to vector<8x8xbf16>
    %cst_36 = arith.constant dense<0.000000e+00> : vector<8x8xf32>
    %52 = tpu.matmul %49, %50, %cst_36 {dimension_numbers = #tpu.dot_dimension_numbers<[1], [1], [0], [0], [0, 0, 1, 0], [], []>} : vector<8x8xbf16>, vector<8x8xbf16>, vector<8x8xf32> -> vector<8x8xf32>
    %c0_37 = arith.constant 0 : index
    %c1 = arith.constant 1 : index
    %53 = vector.load %arg16[%c0_37, %c1] : memref<8x4xf32, #tpu.memory_space<vmem>>, vector<8x1xf32>
    %cst_38 = arith.constant dense<0xFF800000> : vector<8xf32>
    %54 = vector.multi_reduction <maximumf>, %52, %cst_38 [1] : vector<8x8xf32> to vector<8xf32>
    %55 = vector.shape_cast %54 : vector<8xf32> to vector<8x1xf32>
    %56 = arith.maximumf %53, %55 : vector<8x1xf32>
    %57 = arith.subf %53, %56 : vector<8x1xf32>
    %58 = math.exp %57 : vector<8x1xf32>
    %59 = vector.broadcast %56 : vector<8x1xf32> to vector<8x8xf32>
    %60 = arith.subf %52, %59 : vector<8x8xf32>
    %61 = math.exp %60 : vector<8x8xf32>
    %c0_39 = arith.constant 0 : index
    %c1_40 = arith.constant 1 : index
    %62 = vector.load %arg17[%c0_39, %c1_40] : memref<8x4xf32, #tpu.memory_space<vmem>>, vector<8x1xf32>
    %63 = arith.mulf %58, %62 : vector<8x1xf32>
    %cst_41 = arith.constant dense<0.000000e+00> : vector<8xf32>
    %64 = vector.multi_reduction <add>, %61, %cst_41 [1] : vector<8x8xf32> to vector<8xf32>
    %65 = vector.shape_cast %64 : vector<8xf32> to vector<8x1xf32>
    %66 = arith.addf %63, %65 : vector<8x1xf32>
    %c0_42 = arith.constant 0 : index
    %c1_43 = arith.constant 1 : index
    %67 = vector.load %arg17[%c0_42, %c1_43] : memref<8x4xf32, #tpu.memory_space<vmem>>, vector<8x1xf32>
    tpu.vector_store %arg17[%c0_42, %c1_43], %66 {strides = array<i32>} : memref<8x4xf32, #tpu.memory_space<vmem>>, vector<8x1xf32>,
    %c1_44 = arith.constant 1 : index
    %c0_45 = arith.constant 0 : index
    %c0_46 = arith.constant 0 : index
    %68 = vector.load %arg18[%c1_44, %c0_45, %c0_46] : memref<4x8x8xf32, #tpu.memory_space<vmem>>, vector<1x8x8xf32>
    %69 = vector.shape_cast %68 : vector<1x8x8xf32> to vector<8x8xf32>
    %70 = vector.broadcast %58 : vector<8x1xf32> to vector<8x8xf32>
    %71 = arith.mulf %70, %69 : vector<8x8xf32>
    %72 = arith.truncf %61 : vector<8x8xf32> to vector<8x8xbf16>
    %cst_47 = arith.constant dense<0.000000e+00> : vector<8x8xf32>
    %73 = tpu.matmul %72, %51, %cst_47 {dimension_numbers = #tpu.dot_dimension_numbers<[1], [0], [0], [1], [0, 0, 1, 1], [], []>} : vector<8x8xbf16>, vector<8x8xbf16>, vector<8x8xf32> -> vector<8x8xf32>
    %74 = arith.addf %71, %73 : vector<8x8xf32>
    %c1_48 = arith.constant 1 : index
    %c0_49 = arith.constant 0 : index
    %c0_50 = arith.constant 0 : index
    %75 = vector.load %arg18[%c1_48, %c0_49, %c0_50] : memref<4x8x8xf32, #tpu.memory_space<vmem>>, vector<1x8x8xf32>
    %76 = vector.shape_cast %75 : vector<1x8x8xf32> to vector<8x8xf32>
    %77 = vector.shape_cast %74 : vector<8x8xf32> to vector<1x8x8xf32>
    tpu.vector_store %arg18[%c1_48, %c0_49, %c0_50], %77 {strides = array<i32>} : memref<4x8x8xf32, #tpu.memory_space<vmem>>, vector<1x8x8xf32>,
    %c0_51 = arith.constant 0 : index
    %c1_52 = arith.constant 1 : index
    %78 = vector.load %arg16[%c0_51, %c1_52] : memref<8x4xf32, #tpu.memory_space<vmem>>, vector<8x1xf32>
    tpu.vector_store %arg16[%c0_51, %c1_52], %56 {strides = array<i32>} : memref<8x4xf32, #tpu.memory_space<vmem>>, vector<8x1xf32>,
    %c0_53 = arith.constant 0 : index
    %c16 = arith.constant 16 : index
    %79 = vector.load %arg15[%c0_53, %c16] : memref<8x32xbf16, #tpu.memory_space<vmem>>, vector<8x8xbf16>
    %80 = vector.extract_strided_slice %10 {offsets = [0, 16], sizes = [8, 8], strides = [1, 1]} : vector<8x32xbf16> to vector<8x8xbf16>
    %81 = vector.extract_strided_slice %18 {offsets = [0, 16], sizes = [8, 8], strides = [1, 1]} : vector<8x32xbf16> to vector<8x8xbf16>
    %cst_54 = arith.constant dense<0.000000e+00> : vector<8x8xf32>
    %82 = tpu.matmul %79, %80, %cst_54 {dimension_numbers = #tpu.dot_dimension_numbers<[1], [1], [0], [0], [0, 0, 1, 0], [], []>} : vector<8x8xbf16>, vector<8x8xbf16>, vector<8x8xf32> -> vector<8x8xf32>
    %c0_55 = arith.constant 0 : index
    %c2 = arith.constant 2 : index
    %83 = vector.load %arg16[%c0_55, %c2] : memref<8x4xf32, #tpu.memory_space<vmem>>, vector<8x1xf32>
    %cst_56 = arith.constant dense<0xFF800000> : vector<8xf32>
    %84 = vector.multi_reduction <maximumf>, %82, %cst_56 [1] : vector<8x8xf32> to vector<8xf32>
    %85 = vector.shape_cast %84 : vector<8xf32> to vector<8x1xf32>
    %86 = arith.maximumf %83, %85 : vector<8x1xf32>
    %87 = arith.subf %83, %86 : vector<8x1xf32>
    %88 = math.exp %87 : vector<8x1xf32>
    %89 = vector.broadcast %86 : vector<8x1xf32> to vector<8x8xf32>
    %90 = arith.subf %82, %89 : vector<8x8xf32>
    %91 = math.exp %90 : vector<8x8xf32>
    %c0_57 = arith.constant 0 : index
    %c2_58 = arith.constant 2 : index
    %92 = vector.load %arg17[%c0_57, %c2_58] : memref<8x4xf32, #tpu.memory_space<vmem>>, vector<8x1xf32>
    %93 = arith.mulf %88, %92 : vector<8x1xf32>
    %cst_59 = arith.constant dense<0.000000e+00> : vector<8xf32>
    %94 = vector.multi_reduction <add>, %91, %cst_59 [1] : vector<8x8xf32> to vector<8xf32>
    %95 = vector.shape_cast %94 : vector<8xf32> to vector<8x1xf32>
    %96 = arith.addf %93, %95 : vector<8x1xf32>
    %c0_60 = arith.constant 0 : index
    %c2_61 = arith.constant 2 : index
    %97 = vector.load %arg17[%c0_60, %c2_61] : memref<8x4xf32, #tpu.memory_space<vmem>>, vector<8x1xf32>
    tpu.vector_store %arg17[%c0_60, %c2_61], %96 {strides = array<i32>} : memref<8x4xf32, #tpu.memory_space<vmem>>, vector<8x1xf32>,
    %c2_62 = arith.constant 2 : index
    %c0_63 = arith.constant 0 : index
    %c0_64 = arith.constant 0 : index
    %98 = vector.load %arg18[%c2_62, %c0_63, %c0_64] : memref<4x8x8xf32, #tpu.memory_space<vmem>>, vector<1x8x8xf32>
    %99 = vector.shape_cast %98 : vector<1x8x8xf32> to vector<8x8xf32>
    %100 = vector.broadcast %88 : vector<8x1xf32> to vector<8x8xf32>
    %101 = arith.mulf %100, %99 : vector<8x8xf32>
    %102 = arith.truncf %91 : vector<8x8xf32> to vector<8x8xbf16>
    %cst_65 = arith.constant dense<0.000000e+00> : vector<8x8xf32>
    %103 = tpu.matmul %102, %81, %cst_65 {dimension_numbers = #tpu.dot_dimension_numbers<[1], [0], [0], [1], [0, 0, 1, 1], [], []>} : vector<8x8xbf16>, vector<8x8xbf16>, vector<8x8xf32> -> vector<8x8xf32>
    %104 = arith.addf %101, %103 : vector<8x8xf32>
    %c2_66 = arith.constant 2 : index
    %c0_67 = arith.constant 0 : index
    %c0_68 = arith.constant 0 : index
    %105 = vector.load %arg18[%c2_66, %c0_67, %c0_68] : memref<4x8x8xf32, #tpu.memory_space<vmem>>, vector<1x8x8xf32>
    %106 = vector.shape_cast %105 : vector<1x8x8xf32> to vector<8x8xf32>
    %107 = vector.shape_cast %104 : vector<8x8xf32> to vector<1x8x8xf32>
    tpu.vector_store %arg18[%c2_66, %c0_67, %c0_68], %107 {strides = array<i32>} : memref<4x8x8xf32, #tpu.memory_space<vmem>>, vector<1x8x8xf32>,
    %c0_69 = arith.constant 0 : index
    %c2_70 = arith.constant 2 : index
    %108 = vector.load %arg16[%c0_69, %c2_70] : memref<8x4xf32, #tpu.memory_space<vmem>>, vector<8x1xf32>
    tpu.vector_store %arg16[%c0_69, %c2_70], %86 {strides = array<i32>} : memref<8x4xf32, #tpu.memory_space<vmem>>, vector<8x1xf32>,
    %c0_71 = arith.constant 0 : index
    %c24 = arith.constant 24 : index
    %109 = vector.load %arg15[%c0_71, %c24] : memref<8x32xbf16, #tpu.memory_space<vmem>>, vector<8x8xbf16>
    %110 = vector.extract_strided_slice %10 {offsets = [0, 24], sizes = [8, 8], strides = [1, 1]} : vector<8x32xbf16> to vector<8x8xbf16>
    %111 = vector.extract_strided_slice %18 {offsets = [0, 24], sizes = [8, 8], strides = [1, 1]} : vector<8x32xbf16> to vector<8x8xbf16>
    %cst_72 = arith.constant dense<0.000000e+00> : vector<8x8xf32>
    %112 = tpu.matmul %109, %110, %cst_72 {dimension_numbers = #tpu.dot_dimension_numbers<[1], [1], [0], [0], [0, 0, 1, 0], [], []>} : vector<8x8xbf16>, vector<8x8xbf16>, vector<8x8xf32> -> vector<8x8xf32>
    %c0_73 = arith.constant 0 : index
    %c3 = arith.constant 3 : index
    %113 = vector.load %arg16[%c0_73, %c3] : memref<8x4xf32, #tpu.memory_space<vmem>>, vector<8x1xf32>
    %cst_74 = arith.constant dense<0xFF800000> : vector<8xf32>
    %114 = vector.multi_reduction <maximumf>, %112, %cst_74 [1] : vector<8x8xf32> to vector<8xf32>
    %115 = vector.shape_cast %114 : vector<8xf32> to vector<8x1xf32>
    %116 = arith.maximumf %113, %115 : vector<8x1xf32>
    %117 = arith.subf %113, %116 : vector<8x1xf32>
    %118 = math.exp %117 : vector<8x1xf32>
    %119 = vector.broadcast %116 : vector<8x1xf32> to vector<8x8xf32>
    %120 = arith.subf %112, %119 : vector<8x8xf32>
    %121 = math.exp %120 : vector<8x8xf32>
    %c0_75 = arith.constant 0 : index
    %c3_76 = arith.constant 3 : index
    %122 = vector.load %arg17[%c0_75, %c3_76] : memref<8x4xf32, #tpu.memory_space<vmem>>, vector<8x1xf32>
    %123 = arith.mulf %118, %122 : vector<8x1xf32>
    %cst_77 = arith.constant dense<0.000000e+00> : vector<8xf32>
    %124 = vector.multi_reduction <add>, %121, %cst_77 [1] : vector<8x8xf32> to vector<8xf32>
    %125 = vector.shape_cast %124 : vector<8xf32> to vector<8x1xf32>
    %126 = arith.addf %123, %125 : vector<8x1xf32>
    %c0_78 = arith.constant 0 : index
    %c3_79 = arith.constant 3 : index
    %127 = vector.load %arg17[%c0_78, %c3_79] : memref<8x4xf32, #tpu.memory_space<vmem>>, vector<8x1xf32>
    tpu.vector_store %arg17[%c0_78, %c3_79], %126 {strides = array<i32>} : memref<8x4xf32, #tpu.memory_space<vmem>>, vector<8x1xf32>,
    %c3_80 = arith.constant 3 : index
    %c0_81 = arith.constant 0 : index
    %c0_82 = arith.constant 0 : index
    %128 = vector.load %arg18[%c3_80, %c0_81, %c0_82] : memref<4x8x8xf32, #tpu.memory_space<vmem>>, vector<1x8x8xf32>
    %129 = vector.shape_cast %128 : vector<1x8x8xf32> to vector<8x8xf32>
    %130 = vector.broadcast %118 : vector<8x1xf32> to vector<8x8xf32>
    %131 = arith.mulf %130, %129 : vector<8x8xf32>
    %132 = arith.truncf %121 : vector<8x8xf32> to vector<8x8xbf16>
    %cst_83 = arith.constant dense<0.000000e+00> : vector<8x8xf32>
    %133 = tpu.matmul %132, %111, %cst_83 {dimension_numbers = #tpu.dot_dimension_numbers<[1], [0], [0], [1], [0, 0, 1, 1], [], []>} : vector<8x8xbf16>, vector<8x8xbf16>, vector<8x8xf32> -> vector<8x8xf32>
    %134 = arith.addf %131, %133 : vector<8x8xf32>
    %c3_84 = arith.constant 3 : index
    %c0_85 = arith.constant 0 : index
    %c0_86 = arith.constant 0 : index
    %135 = vector.load %arg18[%c3_84, %c0_85, %c0_86] : memref<4x8x8xf32, #tpu.memory_space<vmem>>, vector<1x8x8xf32>
    %136 = vector.shape_cast %135 : vector<1x8x8xf32> to vector<8x8xf32>
    %137 = vector.shape_cast %134 : vector<8x8xf32> to vector<1x8x8xf32>
    tpu.vector_store %arg18[%c3_84, %c0_85, %c0_86], %137 {strides = array<i32>} : memref<4x8x8xf32, #tpu.memory_space<vmem>>, vector<1x8x8xf32>,
    %c0_87 = arith.constant 0 : index
    %c3_88 = arith.constant 3 : index
    %138 = vector.load %arg16[%c0_87, %c3_88] : memref<8x4xf32, #tpu.memory_space<vmem>>, vector<8x1xf32>
    tpu.vector_store %arg16[%c0_87, %c3_88], %116 {strides = array<i32>} : memref<8x4xf32, #tpu.memory_space<vmem>>, vector<8x1xf32>,
    %c0_i32_89 = arith.constant 0 : i32
    %139 = arith.cmpi eq, %arg2, %c0_i32_89 : i32
    %140 = arith.extui %139 : i1 to i32
    %c0_i32_90 = arith.constant 0 : i32
    %141 = arith.cmpi ne, %140, %c0_i32_90 : i32
    scf.if %141 {
      %cst_91 = arith.constant 0.000000e+00 : f32
      %142 = vector.broadcast %cst_91 : f32 to vector<8x32xf32>
      %c0_92 = arith.constant 0 : index
      %c0_93 = arith.constant 0 : index
      %143 = vector.load %arg17[%c0_92, %c0_93] : memref<8x4xf32, #tpu.memory_space<vmem>>, vector<8x1xf32>
      %144 = tpu.reciprocal %143 {approx = true} : vector<8x1xf32> -> vector<8x1xf32>
      %c0_94 = arith.constant 0 : index
      %c0_95 = arith.constant 0 : index
      %c0_96 = arith.constant 0 : index
      %145 = vector.load %arg18[%c0_94, %c0_95, %c0_96] : memref<4x8x8xf32, #tpu.memory_space<vmem>>, vector<1x8x8xf32>
      %146 = vector.shape_cast %145 : vector<1x8x8xf32> to vector<8x8xf32>
      %147 = vector.broadcast %144 : vector<8x1xf32> to vector<8x8xf32>
      %148 = arith.mulf %146, %147 : vector<8x8xf32>
      %149 = arith.truncf %148 : vector<8x8xf32> to vector<8x8xbf16>
      %c0_97 = arith.constant 0 : index
      %c0_98 = arith.constant 0 : index
      %150 = vector.load %arg9[%c0_97, %c0_98] : memref<32x32xbf16, #tpu.memory_space<vmem>>, vector<8x32xbf16>
      %cst_99 = arith.constant dense<0.000000e+00> : vector<8x32xf32>
      %151 = tpu.matmul %149, %150, %cst_99 {dimension_numbers = #tpu.dot_dimension_numbers<[1], [0], [0], [1], [0, 0, 1, 1], [], []>} : vector<8x8xbf16>, vector<8x32xbf16>, vector<8x32xf32> -> vector<8x32xf32>
      %152 = arith.addf %142, %151 : vector<8x32xf32>
      %c0_100 = arith.constant 0 : index
      %c1_101 = arith.constant 1 : index
      %153 = vector.load %arg17[%c0_100, %c1_101] : memref<8x4xf32, #tpu.memory_space<vmem>>, vector<8x1xf32>
      %154 = tpu.reciprocal %153 {approx = true} : vector<8x1xf32> -> vector<8x1xf32>
      %c1_102 = arith.constant 1 : index
      %c0_103 = arith.constant 0 : index
      %c0_104 = arith.constant 0 : index
      %155 = vector.load %arg18[%c1_102, %c0_103, %c0_104] : memref<4x8x8xf32, #tpu.memory_space<vmem>>, vector<1x8x8xf32>
      %156 = vector.shape_cast %155 : vector<1x8x8xf32> to vector<8x8xf32>
      %157 = vector.broadcast %154 : vector<8x1xf32> to vector<8x8xf32>
      %158 = arith.mulf %156, %157 : vector<8x8xf32>
      %159 = arith.truncf %158 : vector<8x8xf32> to vector<8x8xbf16>
      %c8_105 = arith.constant 8 : index
      %c0_106 = arith.constant 0 : index
      %160 = vector.load %arg9[%c8_105, %c0_106] : memref<32x32xbf16, #tpu.memory_space<vmem>>, vector<8x32xbf16>
      %cst_107 = arith.constant dense<0.000000e+00> : vector<8x32xf32>
      %161 = tpu.matmul %159, %160, %cst_107 {dimension_numbers = #tpu.dot_dimension_numbers<[1], [0], [0], [1], [0, 0, 1, 1], [], []>} : vector<8x8xbf16>, vector<8x32xbf16>, vector<8x32xf32> -> vector<8x32xf32>
      %162 = arith.addf %152, %161 : vector<8x32xf32>
      %c0_108 = arith.constant 0 : index
      %c2_109 = arith.constant 2 : index
      %163 = vector.load %arg17[%c0_108, %c2_109] : memref<8x4xf32, #tpu.memory_space<vmem>>, vector<8x1xf32>
      %164 = tpu.reciprocal %163 {approx = true} : vector<8x1xf32> -> vector<8x1xf32>
      %c2_110 = arith.constant 2 : index
      %c0_111 = arith.constant 0 : index
      %c0_112 = arith.constant 0 : index
      %165 = vector.load %arg18[%c2_110, %c0_111, %c0_112] : memref<4x8x8xf32, #tpu.memory_space<vmem>>, vector<1x8x8xf32>
      %166 = vector.shape_cast %165 : vector<1x8x8xf32> to vector<8x8xf32>
      %167 = vector.broadcast %164 : vector<8x1xf32> to vector<8x8xf32>
      %168 = arith.mulf %166, %167 : vector<8x8xf32>
      %169 = arith.truncf %168 : vector<8x8xf32> to vector<8x8xbf16>
      %c16_113 = arith.constant 16 : index
      %c0_114 = arith.constant 0 : index
      %170 = vector.load %arg9[%c16_113, %c0_114] : memref<32x32xbf16, #tpu.memory_space<vmem>>, vector<8x32xbf16>
      %cst_115 = arith.constant dense<0.000000e+00> : vector<8x32xf32>
      %171 = tpu.matmul %169, %170, %cst_115 {dimension_numbers = #tpu.dot_dimension_numbers<[1], [0], [0], [1], [0, 0, 1, 1], [], []>} : vector<8x8xbf16>, vector<8x32xbf16>, vector<8x32xf32> -> vector<8x32xf32>
      %172 = arith.addf %162, %171 : vector<8x32xf32>
      %c0_116 = arith.constant 0 : index
      %c3_117 = arith.constant 3 : index
      %173 = vector.load %arg17[%c0_116, %c3_117] : memref<8x4xf32, #tpu.memory_space<vmem>>, vector<8x1xf32>
      %174 = tpu.reciprocal %173 {approx = true} : vector<8x1xf32> -> vector<8x1xf32>
      %c3_118 = arith.constant 3 : index
      %c0_119 = arith.constant 0 : index
      %c0_120 = arith.constant 0 : index
      %175 = vector.load %arg18[%c3_118, %c0_119, %c0_120] : memref<4x8x8xf32, #tpu.memory_space<vmem>>, vector<1x8x8xf32>
      %176 = vector.shape_cast %175 : vector<1x8x8xf32> to vector<8x8xf32>
      %177 = vector.broadcast %174 : vector<8x1xf32> to vector<8x8xf32>
      %178 = arith.mulf %176, %177 : vector<8x8xf32>
      %179 = arith.truncf %178 : vector<8x8xf32> to vector<8x8xbf16>
      %c24_121 = arith.constant 24 : index
      %c0_122 = arith.constant 0 : index
      %180 = vector.load %arg9[%c24_121, %c0_122] : memref<32x32xbf16, #tpu.memory_space<vmem>>, vector<8x32xbf16>
      %cst_123 = arith.constant dense<0.000000e+00> : vector<8x32xf32>
      %181 = tpu.matmul %179, %180, %cst_123 {dimension_numbers = #tpu.dot_dimension_numbers<[1], [0], [0], [1], [0, 0, 1, 1], [], []>} : vector<8x8xbf16>, vector<8x32xbf16>, vector<8x32xf32> -> vector<8x32xf32>
      %182 = arith.addf %172, %181 : vector<8x32xf32>
      %c0_124 = arith.constant 0 : index
      %c0_125 = arith.constant 0 : index
      %183 = vector.load %arg13[%c0_124, %c0_125] : memref<1x32xf32, #tpu.memory_space<vmem>>, vector<1x32xf32>
      %184 = vector.broadcast %183 : vector<1x32xf32> to vector<8x32xf32>
      %185 = arith.addf %182, %184 : vector<8x32xf32>
      %c0_126 = arith.constant 0 : index
      %c0_127 = arith.constant 0 : index
      %c0_128 = arith.constant 0 : index
      %186 = vector.load %arg14[%c0_126, %c0_127, %c0_128] : memref<1x8x32xf32, #tpu.memory_space<vmem>>, vector<1x8x32xf32>
      %187 = vector.shape_cast %186 : vector<1x8x32xf32> to vector<8x32xf32>
      %188 = vector.shape_cast %185 : vector<8x32xf32> to vector<1x8x32xf32>
      tpu.vector_store %arg14[%c0_126, %c0_127, %c0_128], %188 {strides = array<i32>} : memref<1x8x32xf32, #tpu.memory_space<vmem>>, vector<1x8x32xf32>,
    } else {
    }
    return
  }
  func.func @transform_0(%arg0: i32, %arg1: i32, %arg2: i32) -> (i32, i32, i32) {
    %c0_i32 = arith.constant 0 : i32
    %c0_i32_0 = arith.constant 0 : i32
    return %arg0, %arg1, %c0_i32 : i32, i32, i32
  }
  func.func @transform_1(%arg0: i32, %arg1: i32, %arg2: i32) -> (i32, i32, i32) {
    %c0_i32 = arith.constant 0 : i32
    %c0_i32_0 = arith.constant 0 : i32
    return %arg0, %arg2, %c0_i32 : i32, i32, i32
  }
  func.func @transform_2(%arg0: i32, %arg1: i32, %arg2: i32) -> (i32, i32, i32) {
    %c0_i32 = arith.constant 0 : i32
    %c0_i32_0 = arith.constant 0 : i32
    return %arg0, %arg2, %c0_i32 : i32, i32, i32
  }
  func.func @transform_3(%arg0: i32, %arg1: i32, %arg2: i32) -> (i32, i32) {
    %c0_i32 = arith.constant 0 : i32
    %c0_i32_0 = arith.constant 0 : i32
    %c0_i32_1 = arith.constant 0 : i32
    return %c0_i32, %c0_i32_0 : i32, i32
  }
  func.func @transform_4(%arg0: i32, %arg1: i32, %arg2: i32) -> (i32, i32) {
    %c0_i32 = arith.constant 0 : i32
    %c0_i32_0 = arith.constant 0 : i32
    %c0_i32_1 = arith.constant 0 : i32
    return %c0_i32, %c0_i32_0 : i32, i32
  }
  func.func @transform_5(%arg0: i32, %arg1: i32, %arg2: i32) -> (i32, i32) {
    %c0_i32 = arith.constant 0 : i32
    %c0_i32_0 = arith.constant 0 : i32
    %c0_i32_1 = arith.constant 0 : i32
    return %c0_i32, %c0_i32_0 : i32, i32
  }
  func.func @transform_6(%arg0: i32, %arg1: i32, %arg2: i32) -> (i32, i32) {
    %c0_i32 = arith.constant 0 : i32
    %c0_i32_0 = arith.constant 0 : i32
    %c0_i32_1 = arith.constant 0 : i32
    return %c0_i32, %c0_i32_0 : i32, i32
  }
  func.func @transform_7(%arg0: i32, %arg1: i32, %arg2: i32) -> (i32, i32) {
    %c0_i32 = arith.constant 0 : i32
    %c0_i32_0 = arith.constant 0 : i32
    %c0_i32_1 = arith.constant 0 : i32
    return %c0_i32, %c0_i32_0 : i32, i32
  }
  func.func @transform_8(%arg0: i32, %arg1: i32, %arg2: i32) -> (i32, i32) {
    %c0_i32 = arith.constant 0 : i32
    %c0_i32_0 = arith.constant 0 : i32
    %c0_i32_1 = arith.constant 0 : i32
    return %c0_i32, %c0_i32_0 : i32, i32
  }
  func.func @transform_9(%arg0: i32, %arg1: i32, %arg2: i32) -> (i32, i32) {
    %c0_i32 = arith.constant 0 : i32
    %c0_i32_0 = arith.constant 0 : i32
    %c0_i32_1 = arith.constant 0 : i32
    return %c0_i32, %c0_i32_0 : i32, i32
  }
  func.func @transform_10(%arg0: i32, %arg1: i32, %arg2: i32) -> (i32, i32) {
    %c0_i32 = arith.constant 0 : i32
    %c0_i32_0 = arith.constant 0 : i32
    %c0_i32_1 = arith.constant 0 : i32
    return %c0_i32, %c0_i32_0 : i32, i32
  }
  func.func @transform_11(%arg0: i32, %arg1: i32, %arg2: i32) -> (i32, i32, i32) {
    %c0_i32 = arith.constant 0 : i32
    %c0_i32_0 = arith.constant 0 : i32
    return %arg0, %arg1, %c0_i32 : i32, i32, i32
  }
}

</mosaic_0001>

<bundles_post_ra>
// kernel: tpu_custom_call.1
= control target key start
LH: loop header
LB: loop body
LE: loop exit
PB: predicated region body
PF: predicated region fallthrough
CT: control target
= control target key end

     0   :  { %s2307_s0 = inlined_call_operand.hbm [shape: bf16[2,8,32], index: 0, kind: input, shape index: {}]   ;;  %s2308_s1 = inlined_call_operand.hbm [shape: bf16[2,8,32], index: 1, kind: input, shape index: {}]   ;;  %s2309_s2 = inlined_call_operand.hbm [shape: bf16[2,8,32], index: 2, kind: input, shape index: {}]   ;;  %s2310_s3 = inlined_call_operand.hbm [shape: bf16[32,32], index: 3, kind: input, shape index: {}]   ;;  %s2311_s4 = inlined_call_operand.hbm [shape: bf16[32,32], index: 4, kind: input, shape index: {}]   ;;  %s2312_s5 = inlined_call_operand.hbm [shape: bf16[32,32], index: 5, kind: input, shape index: {}]   ;;  %s2313_s6 = inlined_call_operand.hbm [shape: bf16[32,32], index: 6, kind: input, shape index: {}]   ;;  %s2314_s7 = inlined_call_operand.vmem [shape: f32[1,32], index: 7, kind: input, shape index: {}]   ;;  %s2315_s8 = inlined_call_operand.vmem [shape: f32[1,32], index: 8, kind: input, shape index: {}]   ;;  %s2316_s9 = inlined_call_operand.vmem [shape: f32[1,32], index: 9, kind: input, shape index: {}]   ;;  %s2317_s10 = inlined_call_operand.vmem [shape: f32[1,32], index: 10, kind: input, shape index: {}]   ;;  %s2318_s11 = inlined_call_operand.hbm [shape: f32[2,8,32], index: 11, kind: output, shape index: {}]  }
   0x1   :  { %2332 = sst [smem:[#allocation31_spill]] %s2307_s0 }
   0x2   :  { %2333 = sst [smem:[#allocation32_spill]] %s2308_s1 }
   0x3   :  { %2334 = sst [smem:[#allocation33_spill]] %s2310_s3 }
   0x4   :  { %2335 = sst [smem:[#allocation34_spill]] %s2311_s4 }
   0x5   :  { %2336 = sst [smem:[#allocation35_spill]] %s2312_s5 }
   0x6   :  { %2337 = sst [smem:[#allocation36_spill]] %s2313_s6 }
   0x7   :  { %2338 = sst [smem:[#allocation37_spill]] %s2317_s10 }
   0x8   :  { %16 = vsyncpa [#allocation7], 0 }
   0x9   :  { %18 = vsyncpa [#allocation7 + $0x1], 0 }
   0xa   :  { %19 = vsyncpa [#allocation10], 0 }
   0xb   :  { %21 = vsyncpa [#allocation10 + $0x1], 0 }
   0xc   :  { %22 = vsyncpa [#allocation13], 0 }
   0xd   :  { %23 = vsyncpa [#allocation16], 0 }
   0xe   :  { %24 = vsyncpa [#allocation8], 0 }
   0xf   :  { %26 = vsyncpa [#allocation8 + $0x1], 0  ;;  %s1957_s17 = smov 0   ;;  %s1959_s18 = smov 0  }
  0x10   :  { %s1961_s19 = smov 0   ;;  %s1963_s20 = smov 0  }
  0x11   :  { %s1965_s21 = smov 0   ;;  %s1967_s22 = smov 0  }
  0x12 LB: > { %2339 = sst [smem:[#allocation24_spill]] %s1860_s17  ;;  %s1988_s23 = sadd.s32 4294967295, %s1880_s22   ;;  %s1880_s22 = sphi %s1967_s22, %s32_s22   ;;  %s1876_s21 = sphi %s1965_s21, %s2369_s21   ;;  %s1872_s20 = sphi %s1963_s20, %s2368_s20   ;;  %s1868_s19 = sphi %s1961_s19, %s2372_s19   ;;  %s1864_s18 = sphi %s1959_s18, %s2371_s18   ;;  %s1860_s17 = sphi %s1957_s17, %s2370_s17  }
  0x13   : > { %2340 = sst [smem:[#allocation25_spill]] %s1876_s21  ;;  %p1347_p0 = scmp.ge.s32.totalorder %s1880_s22, 1 }
  0x14   : > { %2341 = sst [smem:[#allocation26_spill]] %s1880_s22  ;;  %p74_p1 = scmp.eq.s32.totalorder %s1988_s23, 0 }
  0x15   : > { %p336_p2 = scmp.lt.s32.totalorder %s1880_s22, 3  ;;  %s2342_s3 = sld [smem:[#allocation33_spill]] }
  0x16   : > { %s1882_s28 = smov [#allocation12]   ;;  %p1352_p6 = scmp.ge.s32.totalorder %s1880_s22, 2 }
  0x17   : > { %p1996_p3 = pnand %p1347_p0, %p336_p2  ;;  %s349_s29 = sshll.u32 %s1882_s28, 4  ;;  %s350_s29 = int_to_ptr.vmem [resolvable:$true] %s349_s29 }
  0x18   : > { %s2345_s5 = sld [smem:[#allocation35_spill]]  ;;  %s2319_s15 = smov 64  }
  0x19   : > { %p1441_p4 = pneg %p1996_p3  ;;  %s2321_s16 = smov 4  }
  0x1a   : > { %s1885_s24 = smov [#allocation15]   ;;  %s1346_s28 = sadd.s32 4294967294, %s1880_s22  }
  0x1b   : > { %s347_s26 = sshll.u32 %s2342_s3, 4  ;;  %p2004_p5 = pnand %p1441_p4, %p74_p1  ;;  %s348_s26 = int_to_ptr.hbm [resolvable:$true] %s347_s26 }
  0x1c   : > { %s377_s25 = sshll.u32 %s1885_s24, 4  ;;  %s51_s12 = sadd.s32 1, %s1876_s21  ;;  %s378_s25 = int_to_ptr.vmem [resolvable:$true] %s377_s25 }
  0x1d   : > { %1444 = dma.hbm_to_vmem [thread:$0]  (!%p2004_p5), %s348_s26, 256, %s350_s29, [#allocation13], %s2319_s15, %s2319_s15, %s2321_s16  }
  0x1e   : > { %s375_s14 = sshll.u32 %s2345_s5, 4  ;;  %p53_p7 = scmp.ge.s32.totalorder %s51_s12, 2  ;;  %s376_s14 = int_to_ptr.hbm [resolvable:$true] %s375_s14 }
  0x1f   : > { %1450 = dma.hbm_to_vmem [thread:$0]  (!%p2004_p5), %s376_s14, 256, %s378_s25, [#allocation16], %s2319_s15, %s2319_s15, %s2321_s16  }
  0x20   : > { %s60_s13 = sadd.s32 1, %s1868_s19  ;;  %p67_p8 = scmp.ne.s32.totalorder %s1868_s19, %s1864_s18 }
  0x21   : > { %p68_p9 = scmp.eq.s32.totalorder %s1880_s22, 0  ;;  %s2374_s12 = smov (%p53_p7, %s51_s12), 0 }
  0x22   : > { %2346 = sst [smem:[#allocation27_spill]] %s2374_s12  ;;  %p73_p11 = scmp.ne.s32.totalorder %s1864_s18, %s1860_s17 }
  0x23   : > { %p2030_p10 = por %p68_p9, %p67_p8  ;;  %s55_s29 = ssub.s32 %s1876_s21, %s2374_s12 }
  0x24   : > { %p323_p12 = scmp.eq.s32.totalorder %s1988_s23, 1  ;;  %p58_p13 = scmp.eq.s32.totalorder %s55_s29, 0 }
  0x25   : > { %p2041_p0 = por %p74_p1, %p73_p11  ;;  %p329_p4 = scmp.eq.s32.totalorder %s1346_s28, 1 }
  0x26   : > { %p2045_p2 = por %p323_p12, %p67_p8  ;;  %p1472_p9 = scmp.lt.s32.totalorder %s1880_s22, 2 }
  0x27   : > { %s2050_s25 = scalar_select %p58_p13, %s1868_s19, %s60_s13  }
  0x28   : > { %s2349_s24 = scalar_select %p2045_p2, 1, 0 }
  0x29   : > { %2351 = sst [smem:[#allocation29_spill]] %s2050_s25  ;;  %p2052_p7 = por %p329_p4, %p73_p11 }
  0x2a   : > { %2350 = sst [smem:[#allocation28_spill]] %s2349_s24  ;;  %s2327_s16 = sand.u32 1, %s1868_s19  }
  0x2b   : > { %s2352_s15 = scalar_select %p2052_p7, 1, 0 }
  0x2c   : > { %s2059_s3 = sshll.u32 %s1876_s21, 2  ;;  %s2063_s29 = sshll.u32 %s2327_s16, 2 }
  0x2d   : > { %2353 = sst [smem:[#allocation30_spill]] %s2352_s15  ;;  %p2067_p8 = pnand %p1472_p9, %p2030_p10 }
  0x2e   : > { %s437_s28 = sand.u32 1, %s1880_s22   ;;  %s2355_s1 = sld [smem:[#allocation32_spill]] }
  0x2f   : > { %s441_s15 = scalar_lea.vmem [#allocation9], %s2063_s29  ;;  %s2356_s4 = sld [smem:[#allocation34_spill]] }
  0x30   : > { %s450_s21 = sshll.u32 %s441_s15, 4  ;;  %s438_s10 = scalar_lea.sflag [#allocation10], %s437_s28  ;;  %s451_s21 = int_to_ptr.vmem [resolvable:$true] %s450_s21 }
  0x31   : > { %s1886_s22 = smov [#allocation14]   ;;  %s2357_s6 = sld [smem:[#allocation36_spill]] }
  0x32   : > { %s363_s12 = sshll.u32 %s1886_s22, 4  ;;  %s2359_s16 = smov 64   ;;  %s364_s12 = int_to_ptr.vmem [resolvable:$true] %s363_s12 }
  0x33   : > { %s1887_s28 = smov [#allocation17]   ;;  %s2360_s0 = sld [smem:[#allocation31_spill]] }
  0x34   : > { %s446_s25 = scalar_lea.hbm %s2355_s1, %s2059_s3  ;;  %s421_s13 = scalar_lea.vmem [#allocation6], %s2063_s29 }
  0x35   : > { %s448_s17 = sshll.u32 %s446_s25, 4  ;;  %s361_s24 = sshll.u32 %s2356_s4, 4  ;;  %s449_s17 = int_to_ptr.hbm [resolvable:$true] %s448_s17  ;;  %s362_s24 = int_to_ptr.hbm [resolvable:$true] %s361_s24 }
  0x36   : > { %1460 = dma.hbm_to_vmem [thread:$0]  (!%p2067_p8), %s449_s17, 64, %s451_s21, %s438_s10  }
  0x37   : > { %s389_s15 = sshll.u32 %s2357_s6, 4  ;;  %s2358_s25 = smov 4   ;;  %s390_s15 = int_to_ptr.hbm [resolvable:$true] %s389_s15 }
  0x38   : > { %1447 = dma.hbm_to_vmem [thread:$0]  (!%p2004_p5), %s362_s24, 256, %s364_s12, [#allocation13], %s2359_s16, %s2359_s16, %s2358_s25  }
  0x39   : > { %s391_s17 = sshll.u32 %s1887_s28, 4  ;;  %s426_s22 = scalar_lea.hbm %s2360_s0, %s2059_s3  ;;  %s392_s17 = int_to_ptr.vmem [resolvable:$true] %s391_s17 }
  0x3a   : > { %1453 = dma.hbm_to_vmem [thread:$0]  (!%p2004_p5), %s390_s15, 256, %s392_s17, [#allocation16], %s2359_s16, %s2359_s16, %s2358_s25  }
  0x3b   : > { %s428_s1 = sshll.u32 %s426_s22, 4  ;;  %s430_s4 = sshll.u32 %s421_s13, 4  ;;  %s429_s1 = int_to_ptr.hbm [resolvable:$true] %s428_s1  ;;  %s431_s4 = int_to_ptr.vmem [resolvable:$true] %s430_s4 }
  0x3c   : > { %s2361_s6 = sand.u32 1, %s1868_s19   ;;  %s466_s21 = scalar_lea.hbm %s2309_s2, %s2059_s3 }
  0x3d   : > { %s418_s24 = scalar_lea.sflag [#allocation7], %s2361_s6  ;;  %s468_s26 = sshll.u32 %s466_s21, 4  ;;  %s469_s26 = int_to_ptr.hbm [resolvable:$true] %s468_s26 }
  0x3e   : > { %1457 = dma.hbm_to_vmem [thread:$0]  (!%p2067_p8), %s429_s1, 64, %s431_s4, %s418_s24  }
  0x3f   : > { %s461_s0 = scalar_lea.vmem [#allocation11], %s2063_s29  ;;  %479 = sbr.rel (%p1996_p3) target bundleno = 1156 (0x484), region = 64 }
  0x40   : > { %s470_s30 = sshll.u32 %s461_s0, 4  ;;  %s2114_s15 = sand.u32 (!%p1996_p3), 1, %s1864_s18   ;;  %s471_s30 = int_to_ptr.vmem [resolvable:$true] %s470_s30 }
  0x41   : > { %1463 = dma.hbm_to_vmem [thread:$0]  (!%p2067_p8), %s469_s26, 64, %s471_s30, %s438_s10  }
  0x42   : > { %s2117_s4 = sshll.u32 (!%p1996_p3), %s2114_s15, 2  ;;  %s482_s3 = scalar_lea.sflag (!%p1996_p3), [#allocation7], %s2114_s15 }
  0x43   : > { %s485_s6 = scalar_lea.vmem (!%p1996_p3), [#allocation6], %s2117_s4 }
  0x44   : > { %1839 = dma.done.wait (%p2041_p0), %s482_s3, 64  }
  0x45   : > { %1841 = vsyncadd (%p2041_p0), %s482_s3, 4294967232  ;;  %s491_s0 = sand.u32 1, %s1988_s23   ;;  %s495_s10 = scalar_lea.vmem [#allocation9], %s2117_s4 }
  0x46   : > { %s492_s5 = scalar_lea.sflag [#allocation10], %s491_s0 }
  0x47   : > { %1843 = dma.done.wait (%p2041_p0), %s492_s5, 128  }
  0x48   : > { %1845 = vsyncadd (%p2041_p0), %s492_s5, 4294967168  ;;  %s505_s27 = scalar_lea.vmem [#allocation11], %s2117_s4 }
  0x49   : > { %1847 = dma.done.wait (%p74_p1), [#allocation13], 512  }
  0x4a   : > { %1849 = vsyncadd (%p74_p1), [#allocation13], 4294966784 }
  0x4b   : > { %1851 = dma.done.wait (%p74_p1), [#allocation16], 512  }
  0x4c   : > { %1853 = vsyncadd (%p74_p1), [#allocation16], 4294966784  ;;  %v1412_v0 = vld [vmem:[#allocation12 + $0x8] sm:$0xff]  ;;  %v1414_v1 = vld [vmem:[#allocation14 + $0x8] sm:$0xff]  ;;  %vm601_vm0 = vcmask 261120   ;;  %vm619_vm1 = vcmask 257024  }
  0x4d   : > { %v1411_v2 = vld [vmem:[#allocation12] sm:$0xff]  ;;  %611 = vmatpush.bf16.msra.mxu0 %v1412_v0  ;;  %660 = vmatpush.bf16.msra.mxu1 %v1414_v1  ;;  %v1413_v3 = vld [vmem:[#allocation14] sm:$0xff]  ;;  %v580_v4 = vld [vmem:[%s485_s6] sm:$0xf]  ;;  %vm624_vm2 = vcmask 64512   ;;  %s1888_s16 = smov 104  }
  0x4e   : > { %v629_v5 = vld [vmem:[%s495_s10] sm:$0xf]  ;;  %s1889_s17 = smov 120   ;;  %s1890_s22 = smov 112   ;;  %v1416_v29 = vld [vmem:[#allocation15 + $0x8] sm:$0xff]  ;;  %v1415_v31 = vld [vmem:[#allocation15] sm:$0xff] }
  0x4f   : > { %v1554_v6 = vld [vmem:[%s2314_s7] ss:$0 sm:$0xff]  ;;  %698 = vmatpush.bf16.msra.mxu2 %v1416_v29  ;;  %v668_v35 = vld [vmem:[%s505_s27] sm:$0xf]  ;;  %vm621_vm3 = vcmask 31744   ;;  %v1891_v44 = vmov -inf  }
  0x50   : > { %v1555_v7 = vld [vmem:[%s2315_s8] ss:$0 sm:$0xff]  ;;  %622 = vst.msk [vmem:[#allocation3] sm:$0xff] %vm621_vm3, %v1891_v44  ;;  %v1892_v45 = vmov 0.0   ;;  %v1893_v46 = vmov 0   ;;  %vm749_vm4 = vcmask 7168  }
  0x51   : > { %612 = vmatpush.bf16.msra.mxu0 %v1411_v2  ;;  %661 = vmatpush.bf16.msra.mxu1 %v1413_v3  ;;  %623 = vst.msk [vmem:[#allocation4] sm:$0xff] %vm621_vm3, %v1892_v45  ;;  %v1556_v57 = vld [vmem:[%s2316_s9] ss:$0 sm:$0xff]  ;;  %v1894_v3 = vmov 1   ;;  %vm762_vm5 = vcmask 1043456   ;;  %vm834_vm6 = vcmask 15368  }
  0x52   : > { %627 = vst.msk [vmem:[#allocation5 + $0x10] sm:$0xff] %vm624_vm2, %v1892_v45  ;;  %1542 = vset.pattern.permute.xlu2 %v1893_v46  ;;  %1541 = vset.pattern.permute.xlu0 %v1894_v3  ;;  %vm921_vm7 = vcmask 23568   ;;  %vm1005_vm8 = vcmask 31768   ;;  %s1367_s24 = sshll.u32 %s2114_s15, 3  ;;  %s1408_s12 = sshll.u32 %s1872_s20, 3 }
  0x53   : > { %699 = vmatpush.bf16.msra.mxu2 %v1415_v31  ;;  %625 = vst.msk [vmem:[#allocation5] sm:$0xff] %vm624_vm2, %v1892_v45  ;;  %s1174_s26 = scalar_lea.hbm %s2318_s11, %s1408_s12  ;;  %s2362_s3 = sld [smem:[#allocation37_spill]] }
  0x54   : > { %1376 = vmatmul.msk.bf16.vlgmr.msra.gmra.mxu0 %vm601_vm0, %v580_v4  ;;  %1385 = vmatmul.msk.bf16.vlgmr.msra.gmra.mxu1 %vm601_vm0, %v629_v5  ;;  %626 = vst.msk [vmem:[#allocation5 + $0x8] sm:$0xff] %vm624_vm2, %v1892_v45  ;;  %v1895_v5 = vmov 3   ;;  %s574_s0 = scalar_lea.vmem [#allocation18], %s1367_s24  ;;  %s1178_s10 = sshll.u32 %s1174_s26, 4  ;;  %s1179_s10 = int_to_ptr.hbm [resolvable:$true] %s1178_s10 }
  0x55   : > { %628 = vst.msk [vmem:[#allocation5 + $0x18] sm:$0xff] %vm624_vm2, %v1892_v45  ;;  %1543 = vset.pattern.permute.xlu1 %v1895_v5  ;;  %s1176_s5 = sshll.u32 %s574_s0, 4  ;;  %s1163_s20 = scalar_lea.sflag [#allocation8], %s2114_s15  ;;  %s1177_s5 = int_to_ptr.vmem [resolvable:$true] %s1176_s5 }
  0x56   : > { %1394 = vmatmul.msk.bf16.vlgmr.msra.gmra.mxu2 %vm601_vm0, %v668_v35  ;;  %s1800_s27 = sshra.s32 %s1179_s10, 4  ;;  %s1806_s25 = scalar_lea.hbm %s2318_s11, 16  ;;  %s1801_s27 = int_to_ptr.hbm [resolvable:$true] %s1800_s27 }
  0x57   : > { %v2178_v49 = vld [vmem:[#allocation3] sm:$0xff]  ;;  %s1802_s14 = scalar_lea.hbm %s1801_s27, 8  ;;  %p1807_p10 = scmp.lt.s32.totalorder %s1801_s27, %s2318_s11 }
  0x58   : > { %p1803_p1 = scmp.ne.s32.totalorder %s1801_s27, %s1802_s14  ;;  %p1808_p11 = scmp.lt.s32.totalorder %s1806_s25, %s1802_s14 }
  0x5a   : > { %p1804_p3 = pnand %p1803_p1, %p2045_p2  ;;  %p1809_p12 = por %p1808_p11, %p1807_p10 }
  0x5c   : > { %p1805_p5 = pneg %p1804_p3 }
  0x5e   : > { %p1810_p13 = pnand %p1809_p12, %p1805_p5 }
  0xd1   : > { %v614_v8 = vpop.f32.mrf.mxu0  ;;  %v663_v9 = vpop.f32.mrf.mxu1 }
  0xd2   : > { %v615_v10 = vadd.f32 %v1554_v6, %v614_v8  ;;  %v664_v11 = vadd.f32 %v1555_v7, %v663_v9 }
  0xd4   : > { %v618_v12 = vpack.c.bf16 %v615_v10, %v615_v10  ;;  %v667_v13 = vpack.c.bf16 %v664_v11, %v664_v11 }
  0xd6   : > { %620 = vst.msk [vmem:[#allocation2] sm:$0xf] %vm619_vm1, %v618_v12  ;;  %v789_v14 = vunpack.c.l.b16 %v667_v13  ;;  %v712_v15 = vsel %vm624_vm2, %v667_v13, 0 }
  0xd7   : > { %721 = vmatpush.bf16.xpose.msra.mxu3 %v712_v15 }
  0xd8   : > { %v790_v16 = vpack.c.b16 %v789_v14, %v789_v14 }
  0xd9   : > { %v665_v17 = vpop.f32.mrf.mxu1  ;;  %v616_v18 = vpop.f32.mrf.mxu0 }
  0xda   : > { %962 = vrot.lane.b32.xlu2 %v790_v16, %s1888_s16  ;;  %791 = vrot.lane.b32.xlu0 %v790_v16, %s1889_s17  ;;  %v701_v58 = vpop.f32.mrf.mxu2 }
  0xdb   : > { %v702_v59 = vadd.f32 %v1556_v57, %v701_v58 }
  0xdd   : > { %v706_v19 = vld [vmem:[#allocation2] sm:$0xf]  ;;  %v705_v60 = vpack.c.bf16 %v702_v59, %v702_v59 }
  0xde   : > { %v782_v20 = vld [vmem:[#allocation2] sm:$0xf]  ;;  %1395 = vmatmul.msk.bf16.vlgmr.msra.gmra.mxu3 %vm624_vm2, %v706_v19 }
  0xdf   : > { %v784_v21 = vunpack.c.l.b16 %v782_v20  ;;  %v956_v22 = vld [vmem:[#allocation2] sm:$0xf]  ;;  %v846_v62 = vunpack.c.l.b16 %v705_v60  ;;  %v764_v4 = vsel %vm762_vm5, %v705_v60, 0 }
  0xe0   : > { %v958_v23 = vunpack.c.l.b16 %v956_v22  ;;  %v872_v25 = vld [vmem:[#allocation2] sm:$0xf]  ;;  %773 = vmatpush.bf16.msrb.mxu0 %v764_v4 }
  0xe1   : > { %v785_v24 = vpack.c.b16 %v784_v21, %v784_v21  ;;  %v874_v27 = vunpack.c.l.b16 %v872_v25  ;;  %v847_v1 = vpack.c.b16 %v846_v62, %v846_v62  ;;  %v1896_v21 = vmov 2  }
  0xe2   : > { %v959_v26 = vpack.c.b16 %v958_v23, %v958_v23  ;;  %878 = vrot.lane.b32.xlu0 %v790_v16, %s1890_s22  ;;  %v703_v2 = vpop.f32.mrf.mxu2 }
  0xe3   : > { %786 = vrot.lane.b32.xlu1 %v785_v24, %s1889_s17  ;;  %v875_v28 = vpack.c.b16 %v874_v27, %v874_v27 }
  0xe4   : > { %960 = vrot.lane.b32.xlu2 %v959_v26, %s1888_s16 }
  0xeb   : > { %876 = vrot.lane.b32.xlu1 %v875_v28, %s1890_s22 }
 0x134   : > { %v963_v30 = vpop.permute.xlu2 %962 }
 0x135   : > { %v968_v34 = vsel %vm624_vm2, %v963_v30, 0 }
 0x13e   : > { %v961_v42 = vpop.permute.xlu2 %960 }
 0x14c   : > { %v792_v32 = vpop.permute.xlu0 %791 }
 0x14d   : > { %v797_v33 = vsel %vm624_vm2, %v792_v32, 0 }
 0x14e   : > { %806 = vmatpush.bf16.xpose.msrb.mxu1 %v797_v33 }
 0x154   : > { %v879_v36 = vpop.permute.xlu0 %878 }
 0x155   : > { %v787_v37 = vpop.permute.xlu1 %786  ;;  %v884_v38 = vsel %vm624_vm2, %v879_v36, 0 }
 0x156   : > { %977 = vmatpush.bf16.xpose.msra.mxu1 %v968_v34  ;;  %893 = vmatpush.bf16.xpose.msrb.mxu3 %v884_v38 }
 0x157   : > { %1397 = vmatmul.msk.bf16.vlgmr.msrb.gmra.mxu1 %vm624_vm2, %v787_v37 }
 0x15d   : > { %v877_v39 = vpop.permute.xlu1 %876 }
 0x15e   : > { %1399 = vmatmul.msk.bf16.vlgmr.msrb.gmra.mxu3 %vm624_vm2, %v877_v39 }
 0x161   : > { %v2164_v40 = vpop.f32.mrf.mxu3 }
 0x162   : > { %v728_v41 = vsel %vm624_vm2, %v2164_v40, -inf }
 0x163   : > { %729 = vmax.xlane.f32.xlu0 %v728_v41 }
 0x167   : > { %1401 = vmatmul.msk.bf16.vlgmr.msra.gmra.mxu1 %vm624_vm2, %v961_v42 }
 0x169   : > { %v725_v43 = vpop.f32.mrf.mxu3 }
 0x1d4   : > { %v2174_v47 = vpop.f32.mrf.mxu1 }
 0x1d5   : > { %v813_v48 = vsel %vm624_vm2, %v2174_v47, -inf }
 0x1d6   : > { %814 = vmax.xlane.f32.xlu1 %v813_v48  ;;  %v730_v50 = vpop.xlane.xlu0 %729 }
 0x1d7   : > { %v2181_v51 = vmax.f32 %v2178_v49, %v730_v50 }
 0x1d9   : > { %v732_v52 = vsub.f32 %v2178_v49, %v2181_v51  ;;  %781 = vst.msk [vmem:[#allocation3] sm:$0xff] %vm749_vm4, %v2181_v51 }
 0x1db   : > { %v733_v41 = vmul.f32 1.442695, %v732_v52 }
 0x1dc   : > { %v810_v53 = vpop.f32.mrf.mxu1 }
 0x1e0   : > { %v812_v7 = vld [vmem:[#allocation3] sm:$0xff] }
 0x1e1   : > { %v2187_v54 = vpop.f32.mrf.mxu3 }
 0x1e2   : > { %v900_v55 = vsel %vm624_vm2, %v2187_v54, -inf }
 0x1e3   : > { %901 = vmax.xlane.f32.xlu2 %v900_v55 }
 0x1e4   : > { %v2191_v56 = vpop.f32.mrf.mxu1 }
 0x1e5   : > { %v984_v63 = vsel %vm624_vm2, %v2191_v56, -inf }
 0x1e9   : > { %v897_v61 = vpop.f32.mrf.mxu3 }
 0x1eb   : > { %985 = vmax.xlane.f32.xlu2 %v984_v63 }
 0x1ec   : > { %v981_v0 = vpop.f32.mrf.mxu1 }
 0x1ef   : > { %848 = vrot.lane.b32.xlu1 %v847_v1, %s1889_s17 }
 0x203   : > { %737 = vperm.xlu2 %1542, %v2181_v51   ;;  %v743_v51 = vld [vmem:[#allocation4] sm:$0xff] }
 0x20b   : > { %1016 = vrot.lane.b32.xlu2 %v847_v1, %s1888_s16 }
 0x20c   : > { %1546 = vset.pattern.permute.xlu2 %v1895_v5 }
 0x213   : > { %932 = vrot.lane.b32.xlu2 %v847_v1, %s1890_s22 }
 0x249   : > { %v815_v6 = vpop.xlane.xlu1 %814 }
 0x24a   : > { %v816_v8 = vmax.f32 %v812_v7, %v815_v6 }
 0x24c   : > { %v817_v9 = vsub.f32 %v812_v7, %v816_v8  ;;  %871 = vst.msk [vmem:[#allocation3] sm:$0xff] %vm834_vm6, %v816_v8  ;;  %822 = vperm.xlu0 %1541, %v816_v8   ;;  %v837_v7 = vld [vmem:[#allocation5 + $0x8] sm:$0xff] }
 0x24e   : > { %v818_v39 = vmul.f32 1.442695, %v817_v9 }
 0x253   : > { %v899_v10 = vld [vmem:[#allocation3] sm:$0xff] }
 0x254   : > { %1547 = vset.pattern.permute.xlu0 %v1893_v46 }
 0x256   : > { %v902_v11 = vpop.xlane.xlu2 %901 }
 0x257   : > { %v903_v12 = vmax.f32 %v899_v10, %v902_v11 }
 0x259   : > { %v904_v13 = vsub.f32 %v899_v10, %v903_v12  ;;  %955 = vst.msk [vmem:[#allocation3] sm:$0xff] %vm921_vm7, %v903_v12 }
 0x25b   : > { %v905_v45 = vmul.f32 1.442695, %v904_v13 }
 0x25e   : > { %v986_v14 = vpop.xlane.xlu2 %985 }
 0x260   : > { %v2209_v15 = vld [vmem:[#allocation3] sm:$0xff] }
 0x261   : > { %v2212_v16 = vmax.f32 %v2209_v15, %v986_v14  ;;  %v849_v26 = vpop.permute.xlu1 %848 }
 0x262   : > { %v854_v29 = vsel %vm762_vm5, %v849_v26, 0 }
 0x263   : > { %v988_v17 = vsub.f32 %v2209_v15, %v2212_v16  ;;  %1039 = vst.msk [vmem:[#allocation3] sm:$0xff] %vm1005_vm8, %v2212_v16  ;;  %993 = vperm.xlu1 %1543, %v2212_v16   ;;  %863 = vmatpush.bf16.msrb.mxu2 %v854_v29  ;;  %v924_v16 = vld [vmem:[#allocation5 + $0x10] sm:$0xff] }
 0x265   : > { %v989_v61 = vmul.f32 1.442695, %v988_v17 }
 0x266   : > { %v738_v18 = vpop.permute.xlu2 %737 }
 0x267   : > { %v740_v19 = vsub.f32 %v2164_v40, %v738_v18 }
 0x269   : > { %v741_v20 = vmul.f32 1.442695, %v740_v19 }
 0x26b   : > { %1558 = vpow2.f32 %v741_v20  ;;  %1544 = vset.pattern.permute.xlu1 %v1896_v21  ;;  %v751_v20 = vld [vmem:[#allocation5] sm:$0xff] }
 0x26c   : > { %909 = vperm.xlu1 %1544, %v903_v12  }
 0x26e   : > { %v1017_v25 = vpop.permute.xlu2 %1016 }
 0x26f   : > { %v1022_v27 = vsel %vm762_vm5, %v1017_v25, 0 }
 0x270   : > { %1031 = vmatpush.bf16.msra.mxu2 %v1022_v27 }
 0x271   : > { %v1559_v22 = vpop.eup %1558 }
 0x272   : > { %v758_v23 = vpack.c.bf16 %v1559_v22, %v1559_v22  ;;  %v745_v24 = vsel %vm624_vm2, %v1559_v22, 0.0 }
 0x274   : > { %1396 = vmatmul.msk.bf16.vlgmr.msrb.gmra.mxu0 %vm624_vm2, %v758_v23  ;;  %1545 = vset.pattern.permute.xlu1 %v1894_v3 }
 0x276   : > { %746 = vadd.xlane.f32.xlu0 %v745_v24  ;;  %v933_v28 = vpop.permute.xlu2 %932 }
 0x277   : > { %v938_v30 = vsel %vm762_vm5, %v933_v28, 0 }
 0x278   : > { %947 = vmatpush.bf16.msra.mxu0 %v938_v30 }
 0x2be   : > { %v823_v31 = vpop.permute.xlu0 %822 }
 0x2bf   : > { %v825_v32 = vsub.f32 %v2174_v47, %v823_v31 }
 0x2c1   : > { %v826_v33 = vmul.f32 1.442695, %v825_v32 }
 0x2c3   : > { %1560 = vpow2.f32 %v826_v33 }
 0x2c9   : > { %v1561_v34 = vpop.eup %1560 }
 0x2ca   : > { %v830_v35 = vsel %vm624_vm2, %v1561_v34, 0.0  ;;  %v844_v36 = vpack.c.bf16 %v1561_v34, %v1561_v34 }
 0x2cb   : > { %831 = vadd.xlane.f32.xlu1 %v830_v35 }
 0x2cc   : > { %1398 = vmatmul.msk.bf16.vlgmr.msrb.gmra.mxu2 %vm624_vm2, %v844_v36 }
 0x2d5   : > { %v994_v37 = vpop.permute.xlu1 %993 }
 0x2d6   : > { %v996_v38 = vsub.f32 %v2191_v56, %v994_v37  ;;  %v1061_v37 = vld [vmem:[#allocation17 + $0x4] sm:$0xf] }
 0x2d8   : > { %v997_v40 = vmul.f32 1.442695, %v996_v38  ;;  %v1066_v38 = vsel %vm762_vm5, %v1061_v37, 0 }
 0x2d9   : > { %1075 = vmatpush.bf16.msra.mxu3 %v1066_v38 }
 0x2da   : > { %1562 = vpow2.f32 %v997_v40 }
 0x2db   : > { %1564 = vpow2.f32 %v818_v39  ;;  %v1053_v39 = vld [vmem:[#allocation17] sm:$0xf] }
 0x2dc   : > { %1566 = vpow2.f32 %v733_v41  ;;  %v1085_v40 = vsel %vm762_vm5, %v1053_v39, 0  ;;  %v1135_v41 = vld [vmem:[#allocation17 + $0xc] sm:$0xf] }
 0x2dd   : > { %1094 = vmatpush.bf16.msrb.mxu0 %v1085_v40 }
 0x2de   : > { %v910_v42 = vpop.permute.xlu1 %909 }
 0x2df   : > { %v912_v43 = vsub.f32 %v2187_v54, %v910_v42  ;;  %v1140_v42 = vsel %vm762_vm5, %v1135_v41, 0 }
 0x2e0   : > { %v1563_v44 = vpop.eup %1562  ;;  %1149 = vmatpush.bf16.msrb.mxu2 %v1140_v42 }
 0x2e1   : > { %v1015_v47 = vpack.c.bf16 %v1563_v44, %v1563_v44  ;;  %v913_v48 = vmul.f32 1.442695, %v912_v43  ;;  %v1001_v50 = vsel %vm624_vm2, %v1563_v44, 0.0  ;;  %v1565_v53 = vpop.eup %1564  ;;  %v1107_v43 = vld [vmem:[#allocation17 + $0x8] sm:$0xf] }
 0x2e2   : > { %1002 = vadd.xlane.f32.xlu0 %v1001_v50  ;;  %v1567_v49 = vpop.eup %1566  ;;  %v1112_v44 = vsel %vm762_vm5, %v1107_v43, 0 }
 0x2e3   : > { %1568 = vpow2.f32 %v913_v48  ;;  %1402 = vmatmul.msk.bf16.vlgmr.msra.gmra.mxu2 %vm624_vm2, %v1015_v47  ;;  %v744_v52 = vmul.f32 %v1567_v49, %v743_v51  ;;  %1121 = vmatpush.bf16.msrb.mxu1 %v1112_v44 }
 0x2e4   : > { %840 = vperm.xlu1 %1545, %v1565_v53   ;;  %1570 = vpow2.f32 %v905_v45 }
 0x2e5   : > { %1572 = vpow2.f32 %v989_v61 }
 0x2e9   : > { %v747_v55 = vpop.xlane.xlu0 %746  ;;  %v1569_v56 = vpop.eup %1568 }
 0x2ea   : > { %v748_v57 = vadd.f32 %v747_v55, %v744_v52  ;;  %v931_v54 = vpack.c.bf16 %v1569_v56, %v1569_v56  ;;  %v917_v58 = vsel %vm624_vm2, %v1569_v56, 0.0  ;;  %v1571_v59 = vpop.eup %1570 }
 0x2eb   : > { %918 = vadd.xlane.f32.xlu2 %v917_v58  ;;  %v1573_v63 = vpop.eup %1572 }
 0x2ec   : > { %750 = vst.msk [vmem:[#allocation4] sm:$0xff] %vm749_vm4, %v748_v57  ;;  %1548 = vset.pattern.permute.xlu1 %v1896_v21  ;;  %1400 = vmatmul.msk.bf16.vlgmr.msra.gmra.mxu0 %vm624_vm2, %v931_v54 }
 0x2ed   : > { %927 = vperm.xlu1 %1548, %v1571_v59  }
 0x2f1   : > { %v775_v60 = vpop.f32.mrf.mxu0 }
 0x2f3   : > { %v828_v0 = vld [vmem:[#allocation4] sm:$0xff] }
 0x2f4   : > { %v829_v1 = vmul.f32 %v1565_v53, %v828_v0 }
 0x2f5   : > { %1550 = vset.pattern.permute.xlu1 %v1895_v5 }
 0x2f6   : > { %754 = vperm.xlu0 %1547, %v1567_v49  }
 0x2f9   : > { %v777_v62 = vpop.f32.mrf.mxu0 }
 0x2fe   : > { %1553 = vset.pattern.permute.xlu0 %v1895_v5 }
 0x303   : > { %1011 = vperm.xlu2 %1546, %v1573_v63  }
 0x30b   : > { %1549 = vset.pattern.permute.xlu2 %v1894_v3  ;;  %v1008_v3 = vld [vmem:[#allocation5 + $0x18] sm:$0xff] }
 0x33e   : > { %v832_v2 = vpop.xlane.xlu1 %831 }
 0x33f   : > { %v833_v4 = vadd.f32 %v832_v2, %v829_v1 }
 0x341   : > { %835 = vst.msk [vmem:[#allocation4] sm:$0xff] %vm834_vm6, %v833_v4 }
 0x348   : > { %v915_v12 = vld [vmem:[#allocation4] sm:$0xff] }
 0x349   : > { %v916_v5 = vmul.f32 %v1571_v59, %v915_v12 }
 0x34f   : > { %v865_v6 = vpop.f32.mrf.mxu2 }
 0x355   : > { %v1003_v15 = vpop.xlane.xlu0 %1002 }
 0x356   : > { %v841_v8 = vpop.permute.xlu1 %840 }
 0x357   : > { %v843_v9 = vmul.f32 %v841_v8, %v837_v7  ;;  %v867_v10 = vpop.f32.mrf.mxu2 }
 0x359   : > { %v869_v11 = vadd.f32 %v865_v6, %v843_v9  ;;  %v1557_v6 = vld [vmem:[%s2362_s3] ss:$0 sm:$0xff] }
 0x35b   : > { %870 = vst.msk [vmem:[#allocation5 + $0x8] sm:$0xff] %vm624_vm2, %v869_v11 }
 0x35e   : > { %v919_v13 = vpop.xlane.xlu2 %918 }
 0x35f   : > { %v920_v14 = vadd.f32 %v919_v13, %v916_v5  ;;  %v928_v17 = vpop.permute.xlu1 %927 }
 0x360   : > { %v930_v23 = vmul.f32 %v928_v17, %v924_v16 }
 0x361   : > { %922 = vst.msk [vmem:[#allocation4] sm:$0xff] %vm921_vm7, %v920_v14 }
 0x366   : > { %v1033_v18 = vpop.f32.mrf.mxu2  ;;  %v1012_v19 = vpop.permute.xlu2 %1011 }
 0x367   : > { %v1014_v22 = vmul.f32 %v1012_v19, %v1008_v3 }
 0x368   : > { %v999_v24 = vld [vmem:[#allocation4] sm:$0xff]  ;;  %v755_v25 = vpop.permute.xlu0 %754 }
 0x369   : > { %v1000_v26 = vmul.f32 %v1573_v63, %v999_v24  ;;  %v1037_v27 = vadd.f32 %v1033_v18, %v1014_v22  ;;  %v757_v28 = vmul.f32 %v755_v25, %v751_v20  ;;  %v949_v29 = vpop.f32.mrf.mxu0 }
 0x36a   : > { %v953_v30 = vadd.f32 %v949_v29, %v930_v23 }
 0x36b   : > { %v1004_v31 = vadd.f32 %v1003_v15, %v1000_v26  ;;  %1038 = vst.msk [vmem:[#allocation5 + $0x18] sm:$0xff] %vm624_vm2, %v1037_v27  ;;  %v779_v32 = vadd.f32 %v775_v60, %v757_v28 }
 0x36c   : > { %954 = vst.msk [vmem:[#allocation5 + $0x10] sm:$0xff] %vm624_vm2, %v953_v30 }
 0x36d   : > { %1006 = vst.msk [vmem:[#allocation4] sm:$0xff] %vm1005_vm8, %v1004_v31 }
 0x36e   : > { %780 = vst.msk [vmem:[#allocation5] sm:$0xff] %vm624_vm2, %v779_v32  ;;  %v1035_v33 = vpop.f32.mrf.mxu2 }
 0x371   : > { %v951_v34 = vpop.f32.mrf.mxu0 }
 0x372   : > { %v1128_v52 = vld [vmem:[#allocation5 + $0x18] sm:$0xff] }
 0x373   : > { %v1100_v57 = vld [vmem:[#allocation5 + $0x10] sm:$0xff] }
 0x374   : > { %v1043_v35 = vld [vmem:[#allocation4] sm:$0xff] }
 0x375   : > { %1574 = vrcp.f32 %v1043_v35  ;;  %v1045_v48 = vld [vmem:[#allocation5] sm:$0xff] }
 0x37b   : > { %v1575_v36 = vpop.eup %1574 }
 0x37c   : > { %1130 = vperm.xlu1 %1550, %v1575_v36   ;;  %1056 = vperm.xlu2 %1549, %v1575_v36  }
 0x384   : > { %1552 = vset.pattern.permute.xlu1 %v1896_v21  ;;  %1551 = vset.pattern.permute.xlu2 %v1893_v46  ;;  %v1054_v21 = vld [vmem:[#allocation5 + $0x8] sm:$0xff] }
 0x385   : > { %1102 = vperm.xlu1 %1552, %v1575_v36   ;;  %1048 = vperm.xlu2 %1551, %v1575_v36  }
 0x3d6   : > { %v1057_v46 = vpop.permute.xlu2 %1056 }
 0x3d7   : > { %v1059_v45 = vmul.f32 %v1057_v46, %v1054_v21 }
 0x3d9   : > { %v1060_v47 = vpack.c.bf16 %v1059_v45, %v1059_v45 }
 0x3db   : > { %1403 = vmatmul.msk.bf16.vlgmr.msra.gmra.mxu3 %vm624_vm2, %v1060_v47 }
 0x3df   : > { %v1049_v50 = vpop.permute.xlu2 %1048 }
 0x3e0   : > { %v1051_v53 = vmul.f32 %v1049_v50, %v1045_v48 }
 0x3e2   : > { %v1052_v49 = vpack.c.bf16 %v1051_v53, %v1051_v53 }
 0x3e4   : > { %1404 = vmatmul.msk.bf16.vlgmr.msrb.gmra.mxu0 %vm624_vm2, %v1052_v49 }
 0x3ee   : > { %v1131_v51 = vpop.permute.xlu1 %1130 }
 0x3ef   : > { %v1133_v55 = vmul.f32 %v1131_v51, %v1128_v52 }
 0x3f1   : > { %v1134_v56 = vpack.c.bf16 %v1133_v55, %v1133_v55 }
 0x3f3   : > { %1406 = vmatmul.msk.bf16.vlgmr.msrb.gmra.mxu2 %vm624_vm2, %v1134_v56 }
 0x3f7   : > { %v1103_v54 = vpop.permute.xlu1 %1102 }
 0x3f8   : > { %v1105_v58 = vmul.f32 %v1103_v54, %v1100_v57 }
 0x3fa   : > { %v1106_v59 = vpack.c.bf16 %v1105_v58, %v1105_v58 }
 0x3fc   : > { %1405 = vmatmul.msk.bf16.vlgmr.msrb.gmra.mxu1 %vm624_vm2, %v1106_v59 }
 0x45e   : > { %v1077_v60 = vpop.f32.mrf.mxu3 }
 0x461   : > { %v1096_v61 = vpop.f32.mrf.mxu0 }
 0x462   : > { %v1097_v1 = vadd.f32 %v1096_v61, %v1077_v60 }
 0x466   : > { %v1079_v62 = vpop.f32.mrf.mxu3 }
 0x469   : > { %v1098_v63 = vpop.f32.mrf.mxu0 }
 0x476   : > { %v1151_v0 = vpop.f32.mrf.mxu2 }
 0x479   : > { %v1123_v2 = vpop.f32.mrf.mxu1 }
 0x47a   : > { %v1127_v4 = vadd.f32 %v1123_v2, %v1097_v1 }
 0x47c   : > { %v1155_v7 = vadd.f32 %v1151_v0, %v1127_v4 }
 0x47e   : > { %v1160_v8 = vadd.f32 %v1557_v6, %v1155_v7  ;;  %v1153_v9 = vpop.f32.mrf.mxu2 }
 0x480   : > { %1161 = vst.msk [vmem:[%s574_s0] sm:$0xff] %vm601_vm0, %v1160_v8 }
 0x481   : > { %v1125_v10 = vpop.f32.mrf.mxu1 }
 0x482   : > { %1813 = shalt.err (!%p1810_p13)
}
 0x483   : > { %1439 = dma.vmem_to_hbm [thread:$0]  (%p2045_p2), %s1177_s5, 128, %s1179_s10, %s1163_s20  }
 0x484 PF: > { %s2364_s15 = sld [smem:[#allocation24_spill]]  ;;  %p1465_p0 = pnand %p1352_p6, %p2052_p7 }
 0x485   : > { %s2366_s1 = sld [smem:[#allocation26_spill]] }
 0x486   : > { %p1466_p4 = pneg %p1465_p0 }
 0x48a   : > { %s1190_s13 = sand.u32 1, %s2364_s15  }
 0x48b   : > { %s1191_s24 = scalar_lea.sflag [#allocation8], %s1190_s13 }
 0x48c   : > { %1855 = dma.done.wait (%p1466_p4), %s1191_s24, 128  }
 0x48d   : > { %1857 = vsyncadd (%p1466_p4), %s1191_s24, 4294967168  ;;  %s32_s22 = sadd.s32 1, %s2366_s1   ;;  %s2367_s12 = sld [smem:[#allocation29_spill]] }
 0x48e   : > { %p29_p9 = scmp.ge.s32.totalorder %s32_s22, 4   ;;  %s2368_s20 = sld [smem:[#allocation25_spill]] }
 0x48f   : > { %s2369_s21 = sld [smem:[#allocation27_spill]]  ;;  %s2370_s17 = smov %s1864_s18 }
 0x490   : > { %s2371_s18 = smov %s1868_s19  ;;  %31 = sbr.rel (!%p29_p9) target bundleno = 18 (0x12), region = 160 }
 0x493   : > { %s2372_s19 = smov %s2367_s12 }
 0x495   :  { %1197 = vsyncpa [#allocation7], 1 }
 0x496   :  { %1199 = vsyncpa [#allocation7 + $0x1], 1 }
 0x497   :  { %1200 = vsyncpa [#allocation10], 1 }
 0x498   :  { %1202 = vsyncpa [#allocation10 + $0x1], 1 }
 0x499   :  { %1203 = vsyncpa [#allocation13], 1 }
 0x49a   :  { %1204 = vsyncpa [#allocation16], 1 }
 0x49b   :  { %1205 = vsyncpa [#allocation8], 1 }
 0x49c   :  { %1207 = vsyncpa [#allocation8 + $0x1], 1 }

// kernel: tpu_custom_call.1
= control target key start
LH: loop header
LB: loop body
LE: loop exit
PB: predicated region body
PF: predicated region fallthrough
CT: control target
= control target key end

     0   :  { %s2307_s0 = inlined_call_operand.hbm [shape: bf16[2,8,32], index: 0, kind: input, shape index: {}]   ;;  %s2308_s1 = inlined_call_operand.hbm [shape: bf16[2,8,32], index: 1, kind: input, shape index: {}]   ;;  %s2309_s2 = inlined_call_operand.hbm [shape: bf16[2,8,32], index: 2, kind: input, shape index: {}]   ;;  %s2310_s3 = inlined_call_operand.hbm [shape: bf16[32,32], index: 3, kind: input, shape index: {}]   ;;  %s2311_s4 = inlined_call_operand.hbm [shape: bf16[32,32], index: 4, kind: input, shape index: {}]   ;;  %s2312_s5 = inlined_call_operand.hbm [shape: bf16[32,32], index: 5, kind: input, shape index: {}]   ;;  %s2313_s6 = inlined_call_operand.hbm [shape: bf16[32,32], index: 6, kind: input, shape index: {}]   ;;  %s2314_s7 = inlined_call_operand.vmem [shape: f32[1,32], index: 7, kind: input, shape index: {}]   ;;  %s2315_s8 = inlined_call_operand.vmem [shape: f32[1,32], index: 8, kind: input, shape index: {}]   ;;  %s2316_s9 = inlined_call_operand.vmem [shape: f32[1,32], index: 9, kind: input, shape index: {}]   ;;  %s2317_s10 = inlined_call_operand.vmem [shape: f32[1,32], index: 10, kind: input, shape index: {}]   ;;  %s2318_s11 = inlined_call_operand.hbm [shape: f32[2,8,32], index: 11, kind: output, shape index: {}]  }
   0x1   :  { %2332 = sst [smem:[#allocation31_spill]] %s2307_s0 }
   0x2   :  { %2333 = sst [smem:[#allocation32_spill]] %s2308_s1 }
   0x3   :  { %2334 = sst [smem:[#allocation33_spill]] %s2310_s3 }
   0x4   :  { %2335 = sst [smem:[#allocation34_spill]] %s2311_s4 }
   0x5   :  { %2336 = sst [smem:[#allocation35_spill]] %s2312_s5 }
   0x6   :  { %2337 = sst [smem:[#allocation36_spill]] %s2313_s6 }
   0x7   :  { %2338 = sst [smem:[#allocation37_spill]] %s2317_s10 }
   0x8   :  { %16 = vsyncpa [#allocation7], 0 }
   0x9   :  { %18 = vsyncpa [#allocation7 + $0x1], 0 }
   0xa   :  { %19 = vsyncpa [#allocation10], 0 }
   0xb   :  { %21 = vsyncpa [#allocation10 + $0x1], 0 }
   0xc   :  { %22 = vsyncpa [#allocation13], 0 }
   0xd   :  { %23 = vsyncpa [#allocation16], 0 }
   0xe   :  { %24 = vsyncpa [#allocation8], 0 }
   0xf   :  { %26 = vsyncpa [#allocation8 + $0x1], 0  ;;  %s1957_s17 = smov 0   ;;  %s1959_s18 = smov 0  }
  0x10   :  { %s1961_s19 = smov 0   ;;  %s1963_s20 = smov 0  }
  0x11   :  { %s1965_s21 = smov 0   ;;  %s1967_s22 = smov 0  }
  0x12 LB: > { %2339 = sst [smem:[#allocation24_spill]] %s1860_s17  ;;  %s1988_s23 = sadd.s32 4294967295, %s1880_s22   ;;  %s1880_s22 = sphi %s1967_s22, %s32_s22   ;;  %s1876_s21 = sphi %s1965_s21, %s2369_s21   ;;  %s1872_s20 = sphi %s1963_s20, %s2368_s20   ;;  %s1868_s19 = sphi %s1961_s19, %s2372_s19   ;;  %s1864_s18 = sphi %s1959_s18, %s2371_s18   ;;  %s1860_s17 = sphi %s1957_s17, %s2370_s17  }
  0x13   : > { %2340 = sst [smem:[#allocation25_spill]] %s1876_s21  ;;  %p1347_p0 = scmp.ge.s32.totalorder %s1880_s22, 1 }
  0x14   : > { %2341 = sst [smem:[#allocation26_spill]] %s1880_s22  ;;  %p74_p1 = scmp.eq.s32.totalorder %s1988_s23, 0 }
  0x15   : > { %p336_p2 = scmp.lt.s32.totalorder %s1880_s22, 3  ;;  %s2342_s3 = sld [smem:[#allocation33_spill]] }
  0x16   : > { %s1882_s28 = smov [#allocation12]   ;;  %p1352_p6 = scmp.ge.s32.totalorder %s1880_s22, 2 }
  0x17   : > { %p1996_p3 = pnand %p1347_p0, %p336_p2  ;;  %s349_s29 = sshll.u32 %s1882_s28, 4  ;;  %s350_s29 = int_to_ptr.vmem [resolvable:$true] %s349_s29 }
  0x18   : > { %s2345_s5 = sld [smem:[#allocation35_spill]]  ;;  %s2319_s15 = smov 64  }
  0x19   : > { %p1441_p4 = pneg %p1996_p3  ;;  %s2321_s16 = smov 4  }
  0x1a   : > { %s1885_s24 = smov [#allocation15]   ;;  %s1346_s28 = sadd.s32 4294967294, %s1880_s22  }
  0x1b   : > { %s347_s26 = sshll.u32 %s2342_s3, 4  ;;  %p2004_p5 = pnand %p1441_p4, %p74_p1  ;;  %s348_s26 = int_to_ptr.hbm [resolvable:$true] %s347_s26 }
  0x1c   : > { %s377_s25 = sshll.u32 %s1885_s24, 4  ;;  %s51_s12 = sadd.s32 1, %s1876_s21  ;;  %s378_s25 = int_to_ptr.vmem [resolvable:$true] %s377_s25 }
  0x1d   : > { %1444 = dma.hbm_to_vmem [thread:$0]  (!%p2004_p5), %s348_s26, 256, %s350_s29, [#allocation13], %s2319_s15, %s2319_s15, %s2321_s16  }
  0x1e   : > { %s375_s14 = sshll.u32 %s2345_s5, 4  ;;  %p53_p7 = scmp.ge.s32.totalorder %s51_s12, 2  ;;  %s376_s14 = int_to_ptr.hbm [resolvable:$true] %s375_s14 }
  0x1f   : > { %1450 = dma.hbm_to_vmem [thread:$0]  (!%p2004_p5), %s376_s14, 256, %s378_s25, [#allocation16], %s2319_s15, %s2319_s15, %s2321_s16  }
  0x20   : > { %s60_s13 = sadd.s32 1, %s1868_s19  ;;  %p67_p8 = scmp.ne.s32.totalorder %s1868_s19, %s1864_s18 }
  0x21   : > { %p68_p9 = scmp.eq.s32.totalorder %s1880_s22, 0  ;;  %s2374_s12 = smov (%p53_p7, %s51_s12), 0 }
  0x22   : > { %2346 = sst [smem:[#allocation27_spill]] %s2374_s12  ;;  %p73_p11 = scmp.ne.s32.totalorder %s1864_s18, %s1860_s17 }
  0x23   : > { %p2030_p10 = por %p68_p9, %p67_p8  ;;  %s55_s29 = ssub.s32 %s1876_s21, %s2374_s12 }
  0x24   : > { %p323_p12 = scmp.eq.s32.totalorder %s1988_s23, 1  ;;  %p58_p13 = scmp.eq.s32.totalorder %s55_s29, 0 }
  0x25   : > { %p2041_p0 = por %p74_p1, %p73_p11  ;;  %p329_p4 = scmp.eq.s32.totalorder %s1346_s28, 1 }
  0x26   : > { %p2045_p2 = por %p323_p12, %p67_p8  ;;  %p1472_p9 = scmp.lt.s32.totalorder %s1880_s22, 2 }
  0x27   : > { %s2050_s25 = scalar_select %p58_p13, %s1868_s19, %s60_s13  }
  0x28   : > { %s2349_s24 = scalar_select %p2045_p2, 1, 0 }
  0x29   : > { %2351 = sst [smem:[#allocation29_spill]] %s2050_s25  ;;  %p2052_p7 = por %p329_p4, %p73_p11 }
  0x2a   : > { %2350 = sst [smem:[#allocation28_spill]] %s2349_s24  ;;  %s2327_s16 = sand.u32 1, %s1868_s19  }
  0x2b   : > { %s2352_s15 = scalar_select %p2052_p7, 1, 0 }
  0x2c   : > { %s2059_s3 = sshll.u32 %s1876_s21, 2  ;;  %s2063_s29 = sshll.u32 %s2327_s16, 2 }
  0x2d   : > { %2353 = sst [smem:[#allocation30_spill]] %s2352_s15  ;;  %p2067_p8 = pnand %p1472_p9, %p2030_p10 }
  0x2e   : > { %s437_s28 = sand.u32 1, %s1880_s22   ;;  %s2355_s1 = sld [smem:[#allocation32_spill]] }
  0x2f   : > { %s441_s15 = scalar_lea.vmem [#allocation9], %s2063_s29  ;;  %s2356_s4 = sld [smem:[#allocation34_spill]] }
  0x30   : > { %s450_s21 = sshll.u32 %s441_s15, 4  ;;  %s438_s10 = scalar_lea.sflag [#allocation10], %s437_s28  ;;  %s451_s21 = int_to_ptr.vmem [resolvable:$true] %s450_s21 }
  0x31   : > { %s1886_s22 = smov [#allocation14]   ;;  %s2357_s6 = sld [smem:[#allocation36_spill]] }
  0x32   : > { %s363_s12 = sshll.u32 %s1886_s22, 4  ;;  %s2359_s16 = smov 64   ;;  %s364_s12 = int_to_ptr.vmem [resolvable:$true] %s363_s12 }
  0x33   : > { %s1887_s28 = smov [#allocation17]   ;;  %s2360_s0 = sld [smem:[#allocation31_spill]] }
  0x34   : > { %s446_s25 = scalar_lea.hbm %s2355_s1, %s2059_s3  ;;  %s421_s13 = scalar_lea.vmem [#allocation6], %s2063_s29 }
  0x35   : > { %s448_s17 = sshll.u32 %s446_s25, 4  ;;  %s361_s24 = sshll.u32 %s2356_s4, 4  ;;  %s449_s17 = int_to_ptr.hbm [resolvable:$true] %s448_s17  ;;  %s362_s24 = int_to_ptr.hbm [resolvable:$true] %s361_s24 }
  0x36   : > { %1460 = dma.hbm_to_vmem [thread:$0]  (!%p2067_p8), %s449_s17, 64, %s451_s21, %s438_s10  }
  0x37   : > { %s389_s15 = sshll.u32 %s2357_s6, 4  ;;  %s2358_s25 = smov 4   ;;  %s390_s15 = int_to_ptr.hbm [resolvable:$true] %s389_s15 }
  0x38   : > { %1447 = dma.hbm_to_vmem [thread:$0]  (!%p2004_p5), %s362_s24, 256, %s364_s12, [#allocation13], %s2359_s16, %s2359_s16, %s2358_s25  }
  0x39   : > { %s391_s17 = sshll.u32 %s1887_s28, 4  ;;  %s426_s22 = scalar_lea.hbm %s2360_s0, %s2059_s3  ;;  %s392_s17 = int_to_ptr.vmem [resolvable:$true] %s391_s17 }
  0x3a   : > { %1453 = dma.hbm_to_vmem [thread:$0]  (!%p2004_p5), %s390_s15, 256, %s392_s17, [#allocation16], %s2359_s16, %s2359_s16, %s2358_s25  }
  0x3b   : > { %s428_s1 = sshll.u32 %s426_s22, 4  ;;  %s430_s4 = sshll.u32 %s421_s13, 4  ;;  %s429_s1 = int_to_ptr.hbm [resolvable:$true] %s428_s1  ;;  %s431_s4 = int_to_ptr.vmem [resolvable:$true] %s430_s4 }
  0x3c   : > { %s2361_s6 = sand.u32 1, %s1868_s19   ;;  %s466_s21 = scalar_lea.hbm %s2309_s2, %s2059_s3 }
  0x3d   : > { %s418_s24 = scalar_lea.sflag [#allocation7], %s2361_s6  ;;  %s468_s26 = sshll.u32 %s466_s21, 4  ;;  %s469_s26 = int_to_ptr.hbm [resolvable:$true] %s468_s26 }
  0x3e   : > { %1457 = dma.hbm_to_vmem [thread:$0]  (!%p2067_p8), %s429_s1, 64, %s431_s4, %s418_s24  }
  0x3f   : > { %s461_s0 = scalar_lea.vmem [#allocation11], %s2063_s29  ;;  %479 = sbr.rel (%p1996_p3) target bundleno = 1156 (0x484), region = 64 }
  0x40   : > { %s470_s30 = sshll.u32 %s461_s0, 4  ;;  %s2114_s15 = sand.u32 (!%p1996_p3), 1, %s1864_s18   ;;  %s471_s30 = int_to_ptr.vmem [resolvable:$true] %s470_s30 }
  0x41   : > { %1463 = dma.hbm_to_vmem [thread:$0]  (!%p2067_p8), %s469_s26, 64, %s471_s30, %s438_s10  }
  0x42   : > { %s2117_s4 = sshll.u32 (!%p1996_p3), %s2114_s15, 2  ;;  %s482_s3 = scalar_lea.sflag (!%p1996_p3), [#allocation7], %s2114_s15 }
  0x43   : > { %s485_s6 = scalar_lea.vmem (!%p1996_p3), [#allocation6], %s2117_s4 }
  0x44   : > { %1839 = dma.done.wait (%p2041_p0), %s482_s3, 64  }
  0x45   : > { %1841 = vsyncadd (%p2041_p0), %s482_s3, 4294967232  ;;  %s491_s0 = sand.u32 1, %s1988_s23   ;;  %s495_s10 = scalar_lea.vmem [#allocation9], %s2117_s4 }
  0x46   : > { %s492_s5 = scalar_lea.sflag [#allocation10], %s491_s0 }
  0x47   : > { %1843 = dma.done.wait (%p2041_p0), %s492_s5, 128  }
  0x48   : > { %1845 = vsyncadd (%p2041_p0), %s492_s5, 4294967168  ;;  %s505_s27 = scalar_lea.vmem [#allocation11], %s2117_s4 }
  0x49   : > { %1847 = dma.done.wait (%p74_p1), [#allocation13], 512  }
  0x4a   : > { %1849 = vsyncadd (%p74_p1), [#allocation13], 4294966784 }
  0x4b   : > { %1851 = dma.done.wait (%p74_p1), [#allocation16], 512  }
  0x4c   : > { %1853 = vsyncadd (%p74_p1), [#allocation16], 4294966784  ;;  %v1412_v0 = vld [vmem:[#allocation12 + $0x8] sm:$0xff]  ;;  %v1414_v1 = vld [vmem:[#allocation14 + $0x8] sm:$0xff]  ;;  %vm601_vm0 = vcmask 261120   ;;  %vm619_vm1 = vcmask 257024  }
  0x4d   : > { %v1411_v2 = vld [vmem:[#allocation12] sm:$0xff]  ;;  %611 = vmatpush.bf16.msra.mxu0 %v1412_v0  ;;  %660 = vmatpush.bf16.msra.mxu1 %v1414_v1  ;;  %v1413_v3 = vld [vmem:[#allocation14] sm:$0xff]  ;;  %v580_v4 = vld [vmem:[%s485_s6] sm:$0xf]  ;;  %vm624_vm2 = vcmask 64512   ;;  %s1888_s16 = smov 104  }
  0x4e   : > { %v629_v5 = vld [vmem:[%s495_s10] sm:$0xf]  ;;  %s1889_s17 = smov 120   ;;  %s1890_s22 = smov 112   ;;  %v1416_v29 = vld [vmem:[#allocation15 + $0x8] sm:$0xff]  ;;  %v1415_v31 = vld [vmem:[#allocation15] sm:$0xff] }
  0x4f   : > { %v1554_v6 = vld [vmem:[%s2314_s7] ss:$0 sm:$0xff]  ;;  %698 = vmatpush.bf16.msra.mxu2 %v1416_v29  ;;  %v668_v35 = vld [vmem:[%s505_s27] sm:$0xf]  ;;  %vm621_vm3 = vcmask 31744   ;;  %v1891_v44 = vmov -inf  }
  0x50   : > { %v1555_v7 = vld [vmem:[%s2315_s8] ss:$0 sm:$0xff]  ;;  %622 = vst.msk [vmem:[#allocation3] sm:$0xff] %vm621_vm3, %v1891_v44  ;;  %v1892_v45 = vmov 0.0   ;;  %v1893_v46 = vmov 0   ;;  %vm749_vm4 = vcmask 7168  }
  0x51   : > { %612 = vmatpush.bf16.msra.mxu0 %v1411_v2  ;;  %661 = vmatpush.bf16.msra.mxu1 %v1413_v3  ;;  %623 = vst.msk [vmem:[#allocation4] sm:$0xff] %vm621_vm3, %v1892_v45  ;;  %v1556_v57 = vld [vmem:[%s2316_s9] ss:$0 sm:$0xff]  ;;  %v1894_v3 = vmov 1   ;;  %vm762_vm5 = vcmask 1043456   ;;  %vm834_vm6 = vcmask 15368  }
  0x52   : > { %627 = vst.msk [vmem:[#allocation5 + $0x10] sm:$0xff] %vm624_vm2, %v1892_v45  ;;  %1542 = vset.pattern.permute.xlu2 %v1893_v46  ;;  %1541 = vset.pattern.permute.xlu0 %v1894_v3  ;;  %vm921_vm7 = vcmask 23568   ;;  %vm1005_vm8 = vcmask 31768   ;;  %s1367_s24 = sshll.u32 %s2114_s15, 3  ;;  %s1408_s12 = sshll.u32 %s1872_s20, 3 }
  0x53   : > { %699 = vmatpush.bf16.msra.mxu2 %v1415_v31  ;;  %625 = vst.msk [vmem:[#allocation5] sm:$0xff] %vm624_vm2, %v1892_v45  ;;  %s1174_s26 = scalar_lea.hbm %s2318_s11, %s1408_s12  ;;  %s2362_s3 = sld [smem:[#allocation37_spill]] }
  0x54   : > { %1376 = vmatmul.msk.bf16.vlgmr.msra.gmra.mxu0 %vm601_vm0, %v580_v4  ;;  %1385 = vmatmul.msk.bf16.vlgmr.msra.gmra.mxu1 %vm601_vm0, %v629_v5  ;;  %626 = vst.msk [vmem:[#allocation5 + $0x8] sm:$0xff] %vm624_vm2, %v1892_v45  ;;  %v1895_v5 = vmov 3   ;;  %s574_s0 = scalar_lea.vmem [#allocation18], %s1367_s24  ;;  %s1178_s10 = sshll.u32 %s1174_s26, 4  ;;  %s1179_s10 = int_to_ptr.hbm [resolvable:$true] %s1178_s10 }
  0x55   : > { %628 = vst.msk [vmem:[#allocation5 + $0x18] sm:$0xff] %vm624_vm2, %v1892_v45  ;;  %1543 = vset.pattern.permute.xlu1 %v1895_v5  ;;  %s1176_s5 = sshll.u32 %s574_s0, 4  ;;  %s1163_s20 = scalar_lea.sflag [#allocation8], %s2114_s15  ;;  %s1177_s5 = int_to_ptr.vmem [resolvable:$true] %s1176_s5 }
  0x56   : > { %1394 = vmatmul.msk.bf16.vlgmr.msra.gmra.mxu2 %vm601_vm0, %v668_v35  ;;  %s1800_s27 = sshra.s32 %s1179_s10, 4  ;;  %s1806_s25 = scalar_lea.hbm %s2318_s11, 16  ;;  %s1801_s27 = int_to_ptr.hbm [resolvable:$true] %s1800_s27 }
  0x57   : > { %v2178_v49 = vld [vmem:[#allocation3] sm:$0xff]  ;;  %s1802_s14 = scalar_lea.hbm %s1801_s27, 8  ;;  %p1807_p10 = scmp.lt.s32.totalorder %s1801_s27, %s2318_s11 }
  0x58   : > { %p1803_p1 = scmp.ne.s32.totalorder %s1801_s27, %s1802_s14  ;;  %p1808_p11 = scmp.lt.s32.totalorder %s1806_s25, %s1802_s14 }
  0x5a   : > { %p1804_p3 = pnand %p1803_p1, %p2045_p2  ;;  %p1809_p12 = por %p1808_p11, %p1807_p10 }
  0x5c   : > { %p1805_p5 = pneg %p1804_p3 }
  0x5e   : > { %p1810_p13 = pnand %p1809_p12, %p1805_p5 }
  0xd1   : > { %v614_v8 = vpop.f32.mrf.mxu0  ;;  %v663_v9 = vpop.f32.mrf.mxu1 }
  0xd2   : > { %v615_v10 = vadd.f32 %v1554_v6, %v614_v8  ;;  %v664_v11 = vadd.f32 %v1555_v7, %v663_v9 }
  0xd4   : > { %v618_v12 = vpack.c.bf16 %v615_v10, %v615_v10  ;;  %v667_v13 = vpack.c.bf16 %v664_v11, %v664_v11 }
  0xd6   : > { %620 = vst.msk [vmem:[#allocation2] sm:$0xf] %vm619_vm1, %v618_v12  ;;  %v789_v14 = vunpack.c.l.b16 %v667_v13  ;;  %v712_v15 = vsel %vm624_vm2, %v667_v13, 0 }
  0xd7   : > { %721 = vmatpush.bf16.xpose.msra.mxu3 %v712_v15 }
  0xd8   : > { %v790_v16 = vpack.c.b16 %v789_v14, %v789_v14 }
  0xd9   : > { %v665_v17 = vpop.f32.mrf.mxu1  ;;  %v616_v18 = vpop.f32.mrf.mxu0 }
  0xda   : > { %962 = vrot.lane.b32.xlu2 %v790_v16, %s1888_s16  ;;  %791 = vrot.lane.b32.xlu0 %v790_v16, %s1889_s17  ;;  %v701_v58 = vpop.f32.mrf.mxu2 }
  0xdb   : > { %v702_v59 = vadd.f32 %v1556_v57, %v701_v58 }
  0xdd   : > { %v706_v19 = vld [vmem:[#allocation2] sm:$0xf]  ;;  %v705_v60 = vpack.c.bf16 %v702_v59, %v702_v59 }
  0xde   : > { %v782_v20 = vld [vmem:[#allocation2] sm:$0xf]  ;;  %1395 = vmatmul.msk.bf16.vlgmr.msra.gmra.mxu3 %vm624_vm2, %v706_v19 }
  0xdf   : > { %v784_v21 = vunpack.c.l.b16 %v782_v20  ;;  %v956_v22 = vld [vmem:[#allocation2] sm:$0xf]  ;;  %v846_v62 = vunpack.c.l.b16 %v705_v60  ;;  %v764_v4 = vsel %vm762_vm5, %v705_v60, 0 }
  0xe0   : > { %v958_v23 = vunpack.c.l.b16 %v956_v22  ;;  %v872_v25 = vld [vmem:[#allocation2] sm:$0xf]  ;;  %773 = vmatpush.bf16.msrb.mxu0 %v764_v4 }
  0xe1   : > { %v785_v24 = vpack.c.b16 %v784_v21, %v784_v21  ;;  %v874_v27 = vunpack.c.l.b16 %v872_v25  ;;  %v847_v1 = vpack.c.b16 %v846_v62, %v846_v62  ;;  %v1896_v21 = vmov 2  }
  0xe2   : > { %v959_v26 = vpack.c.b16 %v958_v23, %v958_v23  ;;  %878 = vrot.lane.b32.xlu0 %v790_v16, %s1890_s22  ;;  %v703_v2 = vpop.f32.mrf.mxu2 }
  0xe3   : > { %786 = vrot.lane.b32.xlu1 %v785_v24, %s1889_s17  ;;  %v875_v28 = vpack.c.b16 %v874_v27, %v874_v27 }
  0xe4   : > { %960 = vrot.lane.b32.xlu2 %v959_v26, %s1888_s16 }
  0xeb   : > { %876 = vrot.lane.b32.xlu1 %v875_v28, %s1890_s22 }
 0x134   : > { %v963_v30 = vpop.permute.xlu2 %962 }
 0x135   : > { %v968_v34 = vsel %vm624_vm2, %v963_v30, 0 }
 0x13e   : > { %v961_v42 = vpop.permute.xlu2 %960 }
 0x14c   : > { %v792_v32 = vpop.permute.xlu0 %791 }
 0x14d   : > { %v797_v33 = vsel %vm624_vm2, %v792_v32, 0 }
 0x14e   : > { %806 = vmatpush.bf16.xpose.msrb.mxu1 %v797_v33 }
 0x154   : > { %v879_v36 = vpop.permute.xlu0 %878 }
 0x155   : > { %v787_v37 = vpop.permute.xlu1 %786  ;;  %v884_v38 = vsel %vm624_vm2, %v879_v36, 0 }
 0x156   : > { %977 = vmatpush.bf16.xpose.msra.mxu1 %v968_v34  ;;  %893 = vmatpush.bf16.xpose.msrb.mxu3 %v884_v38 }
 0x157   : > { %1397 = vmatmul.msk.bf16.vlgmr.msrb.gmra.mxu1 %vm624_vm2, %v787_v37 }
 0x15d   : > { %v877_v39 = vpop.permute.xlu1 %876 }
 0x15e   : > { %1399 = vmatmul.msk.bf16.vlgmr.msrb.gmra.mxu3 %vm624_vm2, %v877_v39 }
 0x161   : > { %v2164_v40 = vpop.f32.mrf.mxu3 }
 0x162   : > { %v728_v41 = vsel %vm624_vm2, %v2164_v40, -inf }
 0x163   : > { %729 = vmax.xlane.f32.xlu0 %v728_v41 }
 0x167   : > { %1401 = vmatmul.msk.bf16.vlgmr.msra.gmra.mxu1 %vm624_vm2, %v961_v42 }
 0x169   : > { %v725_v43 = vpop.f32.mrf.mxu3 }
 0x1d4   : > { %v2174_v47 = vpop.f32.mrf.mxu1 }
 0x1d5   : > { %v813_v48 = vsel %vm624_vm2, %v2174_v47, -inf }
 0x1d6   : > { %814 = vmax.xlane.f32.xlu1 %v813_v48  ;;  %v730_v50 = vpop.xlane.xlu0 %729 }
 0x1d7   : > { %v2181_v51 = vmax.f32 %v2178_v49, %v730_v50 }
 0x1d9   : > { %v732_v52 = vsub.f32 %v2178_v49, %v2181_v51  ;;  %781 = vst.msk [vmem:[#allocation3] sm:$0xff] %vm749_vm4, %v2181_v51 }
 0x1db   : > { %v733_v41 = vmul.f32 1.442695, %v732_v52 }
 0x1dc   : > { %v810_v53 = vpop.f32.mrf.mxu1 }
 0x1e0   : > { %v812_v7 = vld [vmem:[#allocation3] sm:$0xff] }
 0x1e1   : > { %v2187_v54 = vpop.f32.mrf.mxu3 }
 0x1e2   : > { %v900_v55 = vsel %vm624_vm2, %v2187_v54, -inf }
 0x1e3   : > { %901 = vmax.xlane.f32.xlu2 %v900_v55 }
 0x1e4   : > { %v2191_v56 = vpop.f32.mrf.mxu1 }
 0x1e5   : > { %v984_v63 = vsel %vm624_vm2, %v2191_v56, -inf }
 0x1e9   : > { %v897_v61 = vpop.f32.mrf.mxu3 }
 0x1eb   : > { %985 = vmax.xlane.f32.xlu2 %v984_v63 }
 0x1ec   : > { %v981_v0 = vpop.f32.mrf.mxu1 }
 0x1ef   : > { %848 = vrot.lane.b32.xlu1 %v847_v1, %s1889_s17 }
 0x203   : > { %737 = vperm.xlu2 %1542, %v2181_v51   ;;  %v743_v51 = vld [vmem:[#allocation4] sm:$0xff] }
 0x20b   : > { %1016 = vrot.lane.b32.xlu2 %v847_v1, %s1888_s16 }
 0x20c   : > { %1546 = vset.pattern.permute.xlu2 %v1895_v5 }
 0x213   : > { %932 = vrot.lane.b32.xlu2 %v847_v1, %s1890_s22 }
 0x249   : > { %v815_v6 = vpop.xlane.xlu1 %814 }
 0x24a   : > { %v816_v8 = vmax.f32 %v812_v7, %v815_v6 }
 0x24c   : > { %v817_v9 = vsub.f32 %v812_v7, %v816_v8  ;;  %871 = vst.msk [vmem:[#allocation3] sm:$0xff] %vm834_vm6, %v816_v8  ;;  %822 = vperm.xlu0 %1541, %v816_v8   ;;  %v837_v7 = vld [vmem:[#allocation5 + $0x8] sm:$0xff] }
 0x24e   : > { %v818_v39 = vmul.f32 1.442695, %v817_v9 }
 0x253   : > { %v899_v10 = vld [vmem:[#allocation3] sm:$0xff] }
 0x254   : > { %1547 = vset.pattern.permute.xlu0 %v1893_v46 }
 0x256   : > { %v902_v11 = vpop.xlane.xlu2 %901 }
 0x257   : > { %v903_v12 = vmax.f32 %v899_v10, %v902_v11 }
 0x259   : > { %v904_v13 = vsub.f32 %v899_v10, %v903_v12  ;;  %955 = vst.msk [vmem:[#allocation3] sm:$0xff] %vm921_vm7, %v903_v12 }
 0x25b   : > { %v905_v45 = vmul.f32 1.442695, %v904_v13 }
 0x25e   : > { %v986_v14 = vpop.xlane.xlu2 %985 }
 0x260   : > { %v2209_v15 = vld [vmem:[#allocation3] sm:$0xff] }
 0x261   : > { %v2212_v16 = vmax.f32 %v2209_v15, %v986_v14  ;;  %v849_v26 = vpop.permute.xlu1 %848 }
 0x262   : > { %v854_v29 = vsel %vm762_vm5, %v849_v26, 0 }
 0x263   : > { %v988_v17 = vsub.f32 %v2209_v15, %v2212_v16  ;;  %1039 = vst.msk [vmem:[#allocation3] sm:$0xff] %vm1005_vm8, %v2212_v16  ;;  %993 = vperm.xlu1 %1543, %v2212_v16   ;;  %863 = vmatpush.bf16.msrb.mxu2 %v854_v29  ;;  %v924_v16 = vld [vmem:[#allocation5 + $0x10] sm:$0xff] }
 0x265   : > { %v989_v61 = vmul.f32 1.442695, %v988_v17 }
 0x266   : > { %v738_v18 = vpop.permute.xlu2 %737 }
 0x267   : > { %v740_v19 = vsub.f32 %v2164_v40, %v738_v18 }
 0x269   : > { %v741_v20 = vmul.f32 1.442695, %v740_v19 }
 0x26b   : > { %1558 = vpow2.f32 %v741_v20  ;;  %1544 = vset.pattern.permute.xlu1 %v1896_v21  ;;  %v751_v20 = vld [vmem:[#allocation5] sm:$0xff] }
 0x26c   : > { %909 = vperm.xlu1 %1544, %v903_v12  }
 0x26e   : > { %v1017_v25 = vpop.permute.xlu2 %1016 }
 0x26f   : > { %v1022_v27 = vsel %vm762_vm5, %v1017_v25, 0 }
 0x270   : > { %1031 = vmatpush.bf16.msra.mxu2 %v1022_v27 }
 0x271   : > { %v1559_v22 = vpop.eup %1558 }
 0x272   : > { %v758_v23 = vpack.c.bf16 %v1559_v22, %v1559_v22  ;;  %v745_v24 = vsel %vm624_vm2, %v1559_v22, 0.0 }
 0x274   : > { %1396 = vmatmul.msk.bf16.vlgmr.msrb.gmra.mxu0 %vm624_vm2, %v758_v23  ;;  %1545 = vset.pattern.permute.xlu1 %v1894_v3 }
 0x276   : > { %746 = vadd.xlane.f32.xlu0 %v745_v24  ;;  %v933_v28 = vpop.permute.xlu2 %932 }
 0x277   : > { %v938_v30 = vsel %vm762_vm5, %v933_v28, 0 }
 0x278   : > { %947 = vmatpush.bf16.msra.mxu0 %v938_v30 }
 0x2be   : > { %v823_v31 = vpop.permute.xlu0 %822 }
 0x2bf   : > { %v825_v32 = vsub.f32 %v2174_v47, %v823_v31 }
 0x2c1   : > { %v826_v33 = vmul.f32 1.442695, %v825_v32 }
 0x2c3   : > { %1560 = vpow2.f32 %v826_v33 }
 0x2c9   : > { %v1561_v34 = vpop.eup %1560 }
 0x2ca   : > { %v830_v35 = vsel %vm624_vm2, %v1561_v34, 0.0  ;;  %v844_v36 = vpack.c.bf16 %v1561_v34, %v1561_v34 }
 0x2cb   : > { %831 = vadd.xlane.f32.xlu1 %v830_v35 }
 0x2cc   : > { %1398 = vmatmul.msk.bf16.vlgmr.msrb.gmra.mxu2 %vm624_vm2, %v844_v36 }
 0x2d5   : > { %v994_v37 = vpop.permute.xlu1 %993 }
 0x2d6   : > { %v996_v38 = vsub.f32 %v2191_v56, %v994_v37  ;;  %v1061_v37 = vld [vmem:[#allocation17 + $0x4] sm:$0xf] }
 0x2d8   : > { %v997_v40 = vmul.f32 1.442695, %v996_v38  ;;  %v1066_v38 = vsel %vm762_vm5, %v1061_v37, 0 }
 0x2d9   : > { %1075 = vmatpush.bf16.msra.mxu3 %v1066_v38 }
 0x2da   : > { %1562 = vpow2.f32 %v997_v40 }
 0x2db   : > { %1564 = vpow2.f32 %v818_v39  ;;  %v1053_v39 = vld [vmem:[#allocation17] sm:$0xf] }
 0x2dc   : > { %1566 = vpow2.f32 %v733_v41  ;;  %v1085_v40 = vsel %vm762_vm5, %v1053_v39, 0  ;;  %v1135_v41 = vld [vmem:[#allocation17 + $0xc] sm:$0xf] }
 0x2dd   : > { %1094 = vmatpush.bf16.msrb.mxu0 %v1085_v40 }
 0x2de   : > { %v910_v42 = vpop.permute.xlu1 %909 }
 0x2df   : > { %v912_v43 = vsub.f32 %v2187_v54, %v910_v42  ;;  %v1140_v42 = vsel %vm762_vm5, %v1135_v41, 0 }
 0x2e0   : > { %v1563_v44 = vpop.eup %1562  ;;  %1149 = vmatpush.bf16.msrb.mxu2 %v1140_v42 }
 0x2e1   : > { %v1015_v47 = vpack.c.bf16 %v1563_v44, %v1563_v44  ;;  %v913_v48 = vmul.f32 1.442695, %v912_v43  ;;  %v1001_v50 = vsel %vm624_vm2, %v1563_v44, 0.0  ;;  %v1565_v53 = vpop.eup %1564  ;;  %v1107_v43 = vld [vmem:[#allocation17 + $0x8] sm:$0xf] }
 0x2e2   : > { %1002 = vadd.xlane.f32.xlu0 %v1001_v50  ;;  %v1567_v49 = vpop.eup %1566  ;;  %v1112_v44 = vsel %vm762_vm5, %v1107_v43, 0 }
 0x2e3   : > { %1568 = vpow2.f32 %v913_v48  ;;  %1402 = vmatmul.msk.bf16.vlgmr.msra.gmra.mxu2 %vm624_vm2, %v1015_v47  ;;  %v744_v52 = vmul.f32 %v1567_v49, %v743_v51  ;;  %1121 = vmatpush.bf16.msrb.mxu1 %v1112_v44 }
 0x2e4   : > { %840 = vperm.xlu1 %1545, %v1565_v53   ;;  %1570 = vpow2.f32 %v905_v45 }
 0x2e5   : > { %1572 = vpow2.f32 %v989_v61 }
 0x2e9   : > { %v747_v55 = vpop.xlane.xlu0 %746  ;;  %v1569_v56 = vpop.eup %1568 }
 0x2ea   : > { %v748_v57 = vadd.f32 %v747_v55, %v744_v52  ;;  %v931_v54 = vpack.c.bf16 %v1569_v56, %v1569_v56  ;;  %v917_v58 = vsel %vm624_vm2, %v1569_v56, 0.0  ;;  %v1571_v59 = vpop.eup %1570 }
 0x2eb   : > { %918 = vadd.xlane.f32.xlu2 %v917_v58  ;;  %v1573_v63 = vpop.eup %1572 }
 0x2ec   : > { %750 = vst.msk [vmem:[#allocation4] sm:$0xff] %vm749_vm4, %v748_v57  ;;  %1548 = vset.pattern.permute.xlu1 %v1896_v21  ;;  %1400 = vmatmul.msk.bf16.vlgmr.msra.gmra.mxu0 %vm624_vm2, %v931_v54 }
 0x2ed   : > { %927 = vperm.xlu1 %1548, %v1571_v59  }
 0x2f1   : > { %v775_v60 = vpop.f32.mrf.mxu0 }
 0x2f3   : > { %v828_v0 = vld [vmem:[#allocation4] sm:$0xff] }
 0x2f4   : > { %v829_v1 = vmul.f32 %v1565_v53, %v828_v0 }
 0x2f5   : > { %1550 = vset.pattern.permute.xlu1 %v1895_v5 }
 0x2f6   : > { %754 = vperm.xlu0 %1547, %v1567_v49  }
 0x2f9   : > { %v777_v62 = vpop.f32.mrf.mxu0 }
 0x2fe   : > { %1553 = vset.pattern.permute.xlu0 %v1895_v5 }
 0x303   : > { %1011 = vperm.xlu2 %1546, %v1573_v63  }
 0x30b   : > { %1549 = vset.pattern.permute.xlu2 %v1894_v3  ;;  %v1008_v3 = vld [vmem:[#allocation5 + $0x18] sm:$0xff] }
 0x33e   : > { %v832_v2 = vpop.xlane.xlu1 %831 }
 0x33f   : > { %v833_v4 = vadd.f32 %v832_v2, %v829_v1 }
 0x341   : > { %835 = vst.msk [vmem:[#allocation4] sm:$0xff] %vm834_vm6, %v833_v4 }
 0x348   : > { %v915_v12 = vld [vmem:[#allocation4] sm:$0xff] }
 0x349   : > { %v916_v5 = vmul.f32 %v1571_v59, %v915_v12 }
 0x34f   : > { %v865_v6 = vpop.f32.mrf.mxu2 }
 0x355   : > { %v1003_v15 = vpop.xlane.xlu0 %1002 }
 0x356   : > { %v841_v8 = vpop.permute.xlu1 %840 }
 0x357   : > { %v843_v9 = vmul.f32 %v841_v8, %v837_v7  ;;  %v867_v10 = vpop.f32.mrf.mxu2 }
 0x359   : > { %v869_v11 = vadd.f32 %v865_v6, %v843_v9  ;;  %v1557_v6 = vld [vmem:[%s2362_s3] ss:$0 sm:$0xff] }
 0x35b   : > { %870 = vst.msk [vmem:[#allocation5 + $0x8] sm:$0xff] %vm624_vm2, %v869_v11 }
 0x35e   : > { %v919_v13 = vpop.xlane.xlu2 %918 }
 0x35f   : > { %v920_v14 = vadd.f32 %v919_v13, %v916_v5  ;;  %v928_v17 = vpop.permute.xlu1 %927 }
 0x360   : > { %v930_v23 = vmul.f32 %v928_v17, %v924_v16 }
 0x361   : > { %922 = vst.msk [vmem:[#allocation4] sm:$0xff] %vm921_vm7, %v920_v14 }
 0x366   : > { %v1033_v18 = vpop.f32.mrf.mxu2  ;;  %v1012_v19 = vpop.permute.xlu2 %1011 }
 0x367   : > { %v1014_v22 = vmul.f32 %v1012_v19, %v1008_v3 }
 0x368   : > { %v999_v24 = vld [vmem:[#allocation4] sm:$0xff]  ;;  %v755_v25 = vpop.permute.xlu0 %754 }
 0x369   : > { %v1000_v26 = vmul.f32 %v1573_v63, %v999_v24  ;;  %v1037_v27 = vadd.f32 %v1033_v18, %v1014_v22  ;;  %v757_v28 = vmul.f32 %v755_v25, %v751_v20  ;;  %v949_v29 = vpop.f32.mrf.mxu0 }
 0x36a   : > { %v953_v30 = vadd.f32 %v949_v29, %v930_v23 }
 0x36b   : > { %v1004_v31 = vadd.f32 %v1003_v15, %v1000_v26  ;;  %1038 = vst.msk [vmem:[#allocation5 + $0x18] sm:$0xff] %vm624_vm2, %v1037_v27  ;;  %v779_v32 = vadd.f32 %v775_v60, %v757_v28 }
 0x36c   : > { %954 = vst.msk [vmem:[#allocation5 + $0x10] sm:$0xff] %vm624_vm2, %v953_v30 }
 0x36d   : > { %1006 = vst.msk [vmem:[#allocation4] sm:$0xff] %vm1005_vm8, %v1004_v31 }
 0x36e   : > { %780 = vst.msk [vmem:[#allocation5] sm:$0xff] %vm624_vm2, %v779_v32  ;;  %v1035_v33 = vpop.f32.mrf.mxu2 }
 0x371   : > { %v951_v34 = vpop.f32.mrf.mxu0 }
 0x372   : > { %v1128_v52 = vld [vmem:[#allocation5 + $0x18] sm:$0xff] }
 0x373   : > { %v1100_v57 = vld [vmem:[#allocation5 + $0x10] sm:$0xff] }
 0x374   : > { %v1043_v35 = vld [vmem:[#allocation4] sm:$0xff] }
 0x375   : > { %1574 = vrcp.f32 %v1043_v35  ;;  %v1045_v48 = vld [vmem:[#allocation5] sm:$0xff] }
 0x37b   : > { %v1575_v36 = vpop.eup %1574 }
 0x37c   : > { %1130 = vperm.xlu1 %1550, %v1575_v36   ;;  %1056 = vperm.xlu2 %1549, %v1575_v36  }
 0x384   : > { %1552 = vset.pattern.permute.xlu1 %v1896_v21  ;;  %1551 = vset.pattern.permute.xlu2 %v1893_v46  ;;  %v1054_v21 = vld [vmem:[#allocation5 + $0x8] sm:$0xff] }
 0x385   : > { %1102 = vperm.xlu1 %1552, %v1575_v36   ;;  %1048 = vperm.xlu2 %1551, %v1575_v36  }
 0x3d6   : > { %v1057_v46 = vpop.permute.xlu2 %1056 }
 0x3d7   : > { %v1059_v45 = vmul.f32 %v1057_v46, %v1054_v21 }
 0x3d9   : > { %v1060_v47 = vpack.c.bf16 %v1059_v45, %v1059_v45 }
 0x3db   : > { %1403 = vmatmul.msk.bf16.vlgmr.msra.gmra.mxu3 %vm624_vm2, %v1060_v47 }
 0x3df   : > { %v1049_v50 = vpop.permute.xlu2 %1048 }
 0x3e0   : > { %v1051_v53 = vmul.f32 %v1049_v50, %v1045_v48 }
 0x3e2   : > { %v1052_v49 = vpack.c.bf16 %v1051_v53, %v1051_v53 }
 0x3e4   : > { %1404 = vmatmul.msk.bf16.vlgmr.msrb.gmra.mxu0 %vm624_vm2, %v1052_v49 }
 0x3ee   : > { %v1131_v51 = vpop.permute.xlu1 %1130 }
 0x3ef   : > { %v1133_v55 = vmul.f32 %v1131_v51, %v1128_v52 }
 0x3f1   : > { %v1134_v56 = vpack.c.bf16 %v1133_v55, %v1133_v55 }
 0x3f3   : > { %1406 = vmatmul.msk.bf16.vlgmr.msrb.gmra.mxu2 %vm624_vm2, %v1134_v56 }
 0x3f7   : > { %v1103_v54 = vpop.permute.xlu1 %1102 }
 0x3f8   : > { %v1105_v58 = vmul.f32 %v1103_v54, %v1100_v57 }
 0x3fa   : > { %v1106_v59 = vpack.c.bf16 %v1105_v58, %v1105_v58 }
 0x3fc   : > { %1405 = vmatmul.msk.bf16.vlgmr.msrb.gmra.mxu1 %vm624_vm2, %v1106_v59 }
 0x45e   : > { %v1077_v60 = vpop.f32.mrf.mxu3 }
 0x461   : > { %v1096_v61 = vpop.f32.mrf.mxu0 }
 0x462   : > { %v1097_v1 = vadd.f32 %v1096_v61, %v1077_v60 }
 0x466   : > { %v1079_v62 = vpop.f32.mrf.mxu3 }
 0x469   : > { %v1098_v63 = vpop.f32.mrf.mxu0 }
 0x476   : > { %v1151_v0 = vpop.f32.mrf.mxu2 }
 0x479   : > { %v1123_v2 = vpop.f32.mrf.mxu1 }
 0x47a   : > { %v1127_v4 = vadd.f32 %v1123_v2, %v1097_v1 }
 0x47c   : > { %v1155_v7 = vadd.f32 %v1151_v0, %v1127_v4 }
 0x47e   : > { %v1160_v8 = vadd.f32 %v1557_v6, %v1155_v7  ;;  %v1153_v9 = vpop.f32.mrf.mxu2 }
 0x480   : > { %1161 = vst.msk [vmem:[%s574_s0] sm:$0xff] %vm601_vm0, %v1160_v8 }
 0x481   : > { %v1125_v10 = vpop.f32.mrf.mxu1 }
 0x482   : > { %1813 = shalt.err (!%p1810_p13)
}
 0x483   : > { %1439 = dma.vmem_to_hbm [thread:$0]  (%p2045_p2), %s1177_s5, 128, %s1179_s10, %s1163_s20  }
 0x484 PF: > { %s2364_s15 = sld [smem:[#allocation24_spill]]  ;;  %p1465_p0 = pnand %p1352_p6, %p2052_p7 }
 0x485   : > { %s2366_s1 = sld [smem:[#allocation26_spill]] }
 0x486   : > { %p1466_p4 = pneg %p1465_p0 }
 0x48a   : > { %s1190_s13 = sand.u32 1, %s2364_s15  }
 0x48b   : > { %s1191_s24 = scalar_lea.sflag [#allocation8], %s1190_s13 }
 0x48c   : > { %1855 = dma.done.wait (%p1466_p4), %s1191_s24, 128  }
 0x48d   : > { %1857 = vsyncadd (%p1466_p4), %s1191_s24, 4294967168  ;;  %s32_s22 = sadd.s32 1, %s2366_s1   ;;  %s2367_s12 = sld [smem:[#allocation29_spill]] }
 0x48e   : > { %p29_p9 = scmp.ge.s32.totalorder %s32_s22, 4   ;;  %s2368_s20 = sld [smem:[#allocation25_spill]] }
 0x48f   : > { %s2369_s21 = sld [smem:[#allocation27_spill]]  ;;  %s2370_s17 = smov %s1864_s18 }
 0x490   : > { %s2371_s18 = smov %s1868_s19  ;;  %31 = sbr.rel (!%p29_p9) target bundleno = 18 (0x12), region = 160 }
 0x493   : > { %s2372_s19 = smov %s2367_s12 }
 0x495   :  { %1197 = vsyncpa [#allocation7], 1 }
 0x496   :  { %1199 = vsyncpa [#allocation7 + $0x1], 1 }
 0x497   :  { %1200 = vsyncpa [#allocation10], 1 }
 0x498   :  { %1202 = vsyncpa [#allocation10 + $0x1], 1 }
 0x499   :  { %1203 = vsyncpa [#allocation13], 1 }
 0x49a   :  { %1204 = vsyncpa [#allocation16], 1 }
 0x49b   :  { %1205 = vsyncpa [#allocation8], 1 }
 0x49c   :  { %1207 = vsyncpa [#allocation8 + $0x1], 1 }

</bundles_post_ra>
